<compile_context>
chip_gen: v7x
topology: tpu7x:2x2x1
jax: 0.10.0
libtpu: 0.0.40
codegen_flags: <defaults>
</compile_context>

<pallas_src>
import jax
import jax.numpy as jnp
from jax.experimental import pallas as pl
from jax.experimental.pallas import tpu as pltpu

B = 2
H_IN = W_IN = 28
KSZ = 4
C_OUT = 3
C_PAD = 8                     # conv channels padded 3 -> 8 (sublane-clean)
PH = PW = 12                  # pooled spatial size
NPP = PH * PW                 # 144 pooled positions per channel
FEAT = C_OUT * NPP            # 432 = fc1 input features (PyTorch view order)
FEAT_PAD = 512                # lane-clean scratch width for the flattened features
H1, H2, H3 = 512, 64, 10


# ---------------------------------------------------------------------------
# Fused kernel: conv(1->3,k=4) + bias + relu + maxpool2x2  ->  fc1+sigmoid
#               -> fc2+relu -> fc3+log_softmax
# ---------------------------------------------------------------------------
def fused_cnn_kernel(patches_ref, wc_ref, bc_ref,
                     w1_ref, b1_ref, w2_ref, b2_ref, w3_ref, b3_ref,
                     out_ref, h_ref):
    # patches_ref: (4, 16, B*144) f32  im2col patches, one slab per pool offset
    # wc_ref     : (8, 16)   f32      conv weights (out-channels zero-padded 3->8)
    # bc_ref     : (8, 1)    f32      conv bias (zero-padded)
    # w1_ref     : (432, 512) f32     fc1 weight (in, out) — UNPADDED, K=432 dot
    # b1/w2/b2/w3/b3                  remaining fc weights / biases
    # out_ref    : (B, 10)   f32      log-softmax output
    # h_ref      : (B, 512)  f32      VMEM scratch: lane-dense flattened features
    bsz = out_ref.shape[0]

    # ---- conv as 4 MXU matmuls (one per 2x2 pooling offset), fused max-pool ----
    wc = wc_ref[...]                                              # (8, 16)
    conv = [jnp.dot(wc, patches_ref[o], preferred_element_type=jnp.float32)
            for o in range(4)]                                    # each (8, B*144)
    pooled = jnp.maximum(jnp.maximum(conv[0], conv[1]),
                         jnp.maximum(conv[2], conv[3]))
    # relu commutes with max and the bias is offset-invariant, so this is exact.
    act = jnp.maximum(pooled + bc_ref[...], 0.0)                  # (8, B*144)

    # ---- scatter to PyTorch NCHW-flatten order: h[b, c*144 + p] (lane-dense) ----
    h_ref[...] = jnp.zeros_like(h_ref)      # defines pad lanes 432:512 (never read)
    for b in range(bsz):
        for c in range(C_OUT):
            h_ref[b:b + 1, c * NPP:(c + 1) * NPP] = act[c:c + 1, b * NPP:(b + 1) * NPP]

    # ---- MLP: fc1+sigmoid, fc2+relu, fc3+log_softmax (MXU + VPU/EUP) ----
    h = h_ref[...][:, :FEAT]                                      # (B, 432)
    z1 = jnp.dot(h, w1_ref[...], preferred_element_type=jnp.float32) + b1_ref[...]
    a1 = pl.reciprocal(1.0 + jnp.exp(-z1), approx=True)           # sigmoid (EUP rcp)
    z2 = jnp.dot(a1, w2_ref[...], preferred_element_type=jnp.float32) + b2_ref[...]
    a2 = jnp.maximum(z2, 0.0)                                     # relu
    z3 = jnp.dot(a2, w3_ref[...], preferred_element_type=jnp.float32) + b3_ref[...]
    m = jnp.max(z3, axis=-1, keepdims=True)
    s = z3 - m
    lse = jnp.log(jnp.sum(jnp.exp(s), axis=-1, keepdims=True))
    out_ref[...] = s - lse                                        # log_softmax


# ---------------------------------------------------------------------------
# Wrapper: layout plumbing (im2col + small conv-weight padding) + one pallas_call
# ---------------------------------------------------------------------------
def simple_cnn_forward(x, params):
    wc, bc, w1, b1, w2, b2, w3, b3 = params
    bsz = x.shape[0]
    x2 = x[:, 0]                                          # (B, 28, 28)

    # im2col grouped by the 2x2 max-pool offset (di, dj):
    #   patches[di*2+dj, ki*4+kj, b*144 + i*12 + j] = x[b, 0, 2i+di+ki, 2j+dj+kj]
    offs = []
    for di in range(2):
        for dj in range(2):
            taps = [x2[:, di + ki: di + ki + 2 * PH: 2,
                       dj + kj: dj + kj + 2 * PW: 2].reshape(bsz * NPP)
                    for ki in range(KSZ) for kj in range(KSZ)]
            offs.append(jnp.stack(taps, axis=0))          # (16, B*144)
    patches = jnp.stack(offs, axis=0)                     # (4, 16, B*144)

    # Pad conv weights/bias to 8 "channels" (tiny). fc1 weight stays unpadded.
    wc_pad = jnp.zeros((C_PAD, KSZ * KSZ), jnp.float32).at[:C_OUT].set(
        wc.reshape(C_OUT, KSZ * KSZ))
    bc_col = jnp.zeros((C_PAD, 1), jnp.float32).at[:C_OUT, 0].set(bc)

    return pl.pallas_call(
        fused_cnn_kernel,
        out_shape=jax.ShapeDtypeStruct((bsz, H3), jnp.float32),
        in_specs=[pl.BlockSpec(memory_space=pltpu.MemorySpace.VMEM)] * 9,
        out_specs=pl.BlockSpec(memory_space=pltpu.MemorySpace.VMEM),
        scratch_shapes=[pltpu.VMEM((bsz, FEAT_PAD), jnp.float32)],
    )(patches, wc_pad, bc_col, w1, b1.reshape(1, H1),
      w2, b2.reshape(1, H2), w3, b3.reshape(1, H3))


# ---------------------------------------------------------------------------
# Pure-JAX reference (for correctness verification only)
# ---------------------------------------------------------------------------
def reference_forward(x, params):
    wc, bc, w1, b1, w2, b2, w3, b3 = params
    hp = jax.lax.Precision.HIGHEST
    conv = jax.lax.conv_general_dilated(
        x, wc, window_strides=(1, 1), padding="VALID",
        dimension_numbers=("NCHW", "OIHW", "NCHW"), precision=hp)
    conv = conv + bc[None, :, None, None]
    r = jnp.maximum(conv, 0.0)                                   # (B, 3, 25, 25)
    r = r[:, :, :24, :24].reshape(x.shape[0], C_OUT, PH, 2, PW, 2).max(axis=(3, 5))
    h = r.reshape(x.shape[0], FEAT)
    z1 = jax.nn.sigmoid(jnp.dot(h, w1, precision=hp) + b1)
    z2 = jnp.maximum(jnp.dot(z1, w2, precision=hp) + b2, 0.0)
    z3 = jnp.dot(z2, w3, precision=hp) + b3
    return jax.nn.log_softmax(z3, axis=1)


if __name__ == "__main__":
    key = jax.random.PRNGKey(0)
    ks = jax.random.split(key, 9)

    # Deterministic synthetic parameters (shapes per nn.Module __init__).
    wc = jax.random.normal(ks[0], (C_OUT, 1, KSZ, KSZ), jnp.float32) * 0.2
    bc = jax.random.normal(ks[1], (C_OUT,), jnp.float32) * 0.1
    w1 = jax.random.normal(ks[2], (FEAT, H1), jnp.float32) * 0.05   # fc1 (in, out)
    b1 = jax.random.normal(ks[3], (H1,), jnp.float32) * 0.05
    w2 = jax.random.normal(ks[4], (H1, H2), jnp.float32) * 0.05     # fc2
    b2 = jax.random.normal(ks[5], (H2,), jnp.float32) * 0.05
    w3 = jax.random.normal(ks[6], (H2, H3), jnp.float32) * 0.05     # fc3
    b3 = jax.random.normal(ks[7], (H3,), jnp.float32) * 0.05
    params = (wc, bc, w1, b1, w2, b2, w3, b3)

    x = jax.random.normal(ks[8], (B, 1, H_IN, W_IN), jnp.float32)

    out = jax.jit(simple_cnn_forward)(x, params)
    out = jax.block_until_ready(out)

    ref = jax.block_until_ready(reference_forward(x, params))
    assert out.shape == (B, H3) and out.dtype == jnp.float32
    assert jnp.allclose(out, ref, atol=1e-2, rtol=1e-2), (out, ref)

    print("KERNEL_OK")
</pallas_src>

<mosaic_0001>
module attributes {stable_mosaic.version = 11 : i64} {
  func.func @fused_cnn_kernel(%arg0: memref<4x16x288xf32, #tpu.memory_space<vmem>>, %arg1: memref<8x16xf32, #tpu.memory_space<vmem>>, %arg2: memref<8x1xf32, #tpu.memory_space<vmem>>, %arg3: memref<432x512xf32, #tpu.memory_space<vmem>>, %arg4: memref<1x512xf32, #tpu.memory_space<vmem>>, %arg5: memref<512x64xf32, #tpu.memory_space<vmem>>, %arg6: memref<1x64xf32, #tpu.memory_space<vmem>>, %arg7: memref<64x10xf32, #tpu.memory_space<vmem>>, %arg8: memref<1x10xf32, #tpu.memory_space<vmem>>, %arg9: memref<2x10xf32, #tpu.memory_space<vmem>>, %arg10: memref<2x512xf32, #tpu.memory_space<vmem>>) attributes {dimension_semantics = [], scalar_prefetch = 0 : i64, scratch_operands = 1 : i64, tpu.core_type = #tpu.core_type<tc>} {
    %c0 = arith.constant 0 : index
    %c0_0 = arith.constant 0 : index
    %0 = vector.load %arg1[%c0, %c0_0] : memref<8x16xf32, #tpu.memory_space<vmem>>, vector<8x16xf32>
    %c0_1 = arith.constant 0 : index
    %c0_2 = arith.constant 0 : index
    %c0_3 = arith.constant 0 : index
    %1 = vector.load %arg0[%c0_1, %c0_2, %c0_3] : memref<4x16x288xf32, #tpu.memory_space<vmem>>, vector<1x16x288xf32>
    %2 = vector.shape_cast %1 : vector<1x16x288xf32> to vector<16x288xf32>
    %cst = arith.constant dense<0.000000e+00> : vector<8x288xf32>
    %3 = tpu.matmul %0, %2, %cst {dimension_numbers = #tpu.dot_dimension_numbers<[1], [0], [0], [1], [0, 0, 1, 1], [], []>} : vector<8x16xf32>, vector<16x288xf32>, vector<8x288xf32> -> vector<8x288xf32>
    %c1 = arith.constant 1 : index
    %c0_4 = arith.constant 0 : index
    %c0_5 = arith.constant 0 : index
    %4 = vector.load %arg0[%c1, %c0_4, %c0_5] : memref<4x16x288xf32, #tpu.memory_space<vmem>>, vector<1x16x288xf32>
    %5 = vector.shape_cast %4 : vector<1x16x288xf32> to vector<16x288xf32>
    %cst_6 = arith.constant dense<0.000000e+00> : vector<8x288xf32>
    %6 = tpu.matmul %0, %5, %cst_6 {dimension_numbers = #tpu.dot_dimension_numbers<[1], [0], [0], [1], [0, 0, 1, 1], [], []>} : vector<8x16xf32>, vector<16x288xf32>, vector<8x288xf32> -> vector<8x288xf32>
    %c2 = arith.constant 2 : index
    %c0_7 = arith.constant 0 : index
    %c0_8 = arith.constant 0 : index
    %7 = vector.load %arg0[%c2, %c0_7, %c0_8] : memref<4x16x288xf32, #tpu.memory_space<vmem>>, vector<1x16x288xf32>
    %8 = vector.shape_cast %7 : vector<1x16x288xf32> to vector<16x288xf32>
    %cst_9 = arith.constant dense<0.000000e+00> : vector<8x288xf32>
    %9 = tpu.matmul %0, %8, %cst_9 {dimension_numbers = #tpu.dot_dimension_numbers<[1], [0], [0], [1], [0, 0, 1, 1], [], []>} : vector<8x16xf32>, vector<16x288xf32>, vector<8x288xf32> -> vector<8x288xf32>
    %c3 = arith.constant 3 : index
    %c0_10 = arith.constant 0 : index
    %c0_11 = arith.constant 0 : index
    %10 = vector.load %arg0[%c3, %c0_10, %c0_11] : memref<4x16x288xf32, #tpu.memory_space<vmem>>, vector<1x16x288xf32>
    %11 = vector.shape_cast %10 : vector<1x16x288xf32> to vector<16x288xf32>
    %cst_12 = arith.constant dense<0.000000e+00> : vector<8x288xf32>
    %12 = tpu.matmul %0, %11, %cst_12 {dimension_numbers = #tpu.dot_dimension_numbers<[1], [0], [0], [1], [0, 0, 1, 1], [], []>} : vector<8x16xf32>, vector<16x288xf32>, vector<8x288xf32> -> vector<8x288xf32>
    %13 = arith.maximumf %3, %6 : vector<8x288xf32>
    %14 = arith.maximumf %9, %12 : vector<8x288xf32>
    %15 = arith.maximumf %13, %14 : vector<8x288xf32>
    %c0_13 = arith.constant 0 : index
    %c0_14 = arith.constant 0 : index
    %16 = vector.load %arg2[%c0_13, %c0_14] : memref<8x1xf32, #tpu.memory_space<vmem>>, vector<8x1xf32>
    %17 = vector.broadcast %16 : vector<8x1xf32> to vector<8x288xf32>
    %18 = arith.addf %15, %17 : vector<8x288xf32>
    %cst_15 = arith.constant 0.000000e+00 : f32
    %19 = vector.broadcast %cst_15 : f32 to vector<8x288xf32>
    %20 = arith.maximumf %18, %19 : vector<8x288xf32>
    %cst_16 = arith.constant 0.000000e+00 : f32
    %21 = vector.broadcast %cst_16 : f32 to vector<2x512xf32>
    %c0_17 = arith.constant 0 : index
    %c0_18 = arith.constant 0 : index
    %22 = vector.load %arg10[%c0_17, %c0_18] : memref<2x512xf32, #tpu.memory_space<vmem>>, vector<2x512xf32>
    tpu.vector_store %arg10[%c0_17, %c0_18], %21 {strides = array<i32>} : memref<2x512xf32, #tpu.memory_space<vmem>>, vector<2x512xf32>,
    %23 = vector.extract_strided_slice %20 {offsets = [0, 0], sizes = [1, 144], strides = [1, 1]} : vector<8x288xf32> to vector<1x144xf32>
    %c0_19 = arith.constant 0 : index
    %c0_20 = arith.constant 0 : index
    %24 = vector.load %arg10[%c0_19, %c0_20] : memref<2x512xf32, #tpu.memory_space<vmem>>, vector<1x144xf32>
    tpu.vector_store %arg10[%c0_19, %c0_20], %23 {strides = array<i32>} : memref<2x512xf32, #tpu.memory_space<vmem>>, vector<1x144xf32>,
    %25 = vector.extract_strided_slice %20 {offsets = [1, 0], sizes = [1, 144], strides = [1, 1]} : vector<8x288xf32> to vector<1x144xf32>
    %c0_21 = arith.constant 0 : index
    %c144 = arith.constant 144 : index
    %26 = vector.load %arg10[%c0_21, %c144] : memref<2x512xf32, #tpu.memory_space<vmem>>, vector<1x144xf32>
    tpu.vector_store %arg10[%c0_21, %c144], %25 {strides = array<i32>} : memref<2x512xf32, #tpu.memory_space<vmem>>, vector<1x144xf32>,
    %27 = vector.extract_strided_slice %20 {offsets = [2, 0], sizes = [1, 144], strides = [1, 1]} : vector<8x288xf32> to vector<1x144xf32>
    %c0_22 = arith.constant 0 : index
    %c288 = arith.constant 288 : index
    %28 = vector.load %arg10[%c0_22, %c288] : memref<2x512xf32, #tpu.memory_space<vmem>>, vector<1x144xf32>
    tpu.vector_store %arg10[%c0_22, %c288], %27 {strides = array<i32>} : memref<2x512xf32, #tpu.memory_space<vmem>>, vector<1x144xf32>,
    %29 = vector.extract_strided_slice %20 {offsets = [0, 144], sizes = [1, 144], strides = [1, 1]} : vector<8x288xf32> to vector<1x144xf32>
    %c1_23 = arith.constant 1 : index
    %c0_24 = arith.constant 0 : index
    %30 = vector.load %arg10[%c1_23, %c0_24] : memref<2x512xf32, #tpu.memory_space<vmem>>, vector<1x144xf32>
    tpu.vector_store %arg10[%c1_23, %c0_24], %29 {strides = array<i32>} : memref<2x512xf32, #tpu.memory_space<vmem>>, vector<1x144xf32>,
    %31 = vector.extract_strided_slice %20 {offsets = [1, 144], sizes = [1, 144], strides = [1, 1]} : vector<8x288xf32> to vector<1x144xf32>
    %c1_25 = arith.constant 1 : index
    %c144_26 = arith.constant 144 : index
    %32 = vector.load %arg10[%c1_25, %c144_26] : memref<2x512xf32, #tpu.memory_space<vmem>>, vector<1x144xf32>
    tpu.vector_store %arg10[%c1_25, %c144_26], %31 {strides = array<i32>} : memref<2x512xf32, #tpu.memory_space<vmem>>, vector<1x144xf32>,
    %33 = vector.extract_strided_slice %20 {offsets = [2, 144], sizes = [1, 144], strides = [1, 1]} : vector<8x288xf32> to vector<1x144xf32>
    %c1_27 = arith.constant 1 : index
    %c288_28 = arith.constant 288 : index
    %34 = vector.load %arg10[%c1_27, %c288_28] : memref<2x512xf32, #tpu.memory_space<vmem>>, vector<1x144xf32>
    tpu.vector_store %arg10[%c1_27, %c288_28], %33 {strides = array<i32>} : memref<2x512xf32, #tpu.memory_space<vmem>>, vector<1x144xf32>,
    %c0_29 = arith.constant 0 : index
    %c0_30 = arith.constant 0 : index
    %35 = vector.load %arg10[%c0_29, %c0_30] : memref<2x512xf32, #tpu.memory_space<vmem>>, vector<2x512xf32>
    %36 = vector.extract_strided_slice %35 {offsets = [0, 0], sizes = [2, 432], strides = [1, 1]} : vector<2x512xf32> to vector<2x432xf32>
    %c0_31 = arith.constant 0 : index
    %c0_32 = arith.constant 0 : index
    %37 = vector.load %arg3[%c0_31, %c0_32] : memref<432x512xf32, #tpu.memory_space<vmem>>, vector<432x512xf32>
    %cst_33 = arith.constant dense<0.000000e+00> : vector<2x512xf32>
    %38 = tpu.matmul %36, %37, %cst_33 {dimension_numbers = #tpu.dot_dimension_numbers<[1], [0], [0], [1], [0, 0, 1, 1], [], []>} : vector<2x432xf32>, vector<432x512xf32>, vector<2x512xf32> -> vector<2x512xf32>
    %c0_34 = arith.constant 0 : index
    %c0_35 = arith.constant 0 : index
    %39 = vector.load %arg4[%c0_34, %c0_35] : memref<1x512xf32, #tpu.memory_space<vmem>>, vector<1x512xf32>
    %40 = vector.broadcast %39 : vector<1x512xf32> to vector<2x512xf32>
    %41 = arith.addf %38, %40 : vector<2x512xf32>
    %cst_36 = arith.constant 0.000000e+00 : f32
    %42 = vector.broadcast %cst_36 : f32 to vector<2x512xf32>
    %43 = arith.subf %42, %41 : vector<2x512xf32>
    %44 = math.exp %43 : vector<2x512xf32>
    %cst_37 = arith.constant 1.000000e+00 : f32
    %45 = vector.broadcast %cst_37 : f32 to vector<2x512xf32>
    %46 = arith.addf %45, %44 : vector<2x512xf32>
    %47 = tpu.reciprocal %46 {approx = true} : vector<2x512xf32> -> vector<2x512xf32>
    %c0_38 = arith.constant 0 : index
    %c0_39 = arith.constant 0 : index
    %48 = vector.load %arg5[%c0_38, %c0_39] : memref<512x64xf32, #tpu.memory_space<vmem>>, vector<512x64xf32>
    %cst_40 = arith.constant dense<0.000000e+00> : vector<2x64xf32>
    %49 = tpu.matmul %47, %48, %cst_40 {dimension_numbers = #tpu.dot_dimension_numbers<[1], [0], [0], [1], [0, 0, 1, 1], [], []>} : vector<2x512xf32>, vector<512x64xf32>, vector<2x64xf32> -> vector<2x64xf32>
    %c0_41 = arith.constant 0 : index
    %c0_42 = arith.constant 0 : index
    %50 = vector.load %arg6[%c0_41, %c0_42] : memref<1x64xf32, #tpu.memory_space<vmem>>, vector<1x64xf32>
    %51 = vector.broadcast %50 : vector<1x64xf32> to vector<2x64xf32>
    %52 = arith.addf %49, %51 : vector<2x64xf32>
    %cst_43 = arith.constant 0.000000e+00 : f32
    %53 = vector.broadcast %cst_43 : f32 to vector<2x64xf32>
    %54 = arith.maximumf %52, %53 : vector<2x64xf32>
    %c0_44 = arith.constant 0 : index
    %c0_45 = arith.constant 0 : index
    %55 = vector.load %arg7[%c0_44, %c0_45] : memref<64x10xf32, #tpu.memory_space<vmem>>, vector<64x10xf32>
    %cst_46 = arith.constant dense<0.000000e+00> : vector<2x10xf32>
    %56 = tpu.matmul %54, %55, %cst_46 {dimension_numbers = #tpu.dot_dimension_numbers<[1], [0], [0], [1], [0, 0, 1, 1], [], []>} : vector<2x64xf32>, vector<64x10xf32>, vector<2x10xf32> -> vector<2x10xf32>
    %c0_47 = arith.constant 0 : index
    %c0_48 = arith.constant 0 : index
    %57 = vector.load %arg8[%c0_47, %c0_48] : memref<1x10xf32, #tpu.memory_space<vmem>>, vector<1x10xf32>
    %58 = vector.broadcast %57 : vector<1x10xf32> to vector<2x10xf32>
    %59 = arith.addf %56, %58 : vector<2x10xf32>
    %cst_49 = arith.constant dense<0xFF800000> : vector<2xf32>
    %60 = vector.multi_reduction <maximumf>, %59, %cst_49 [1] : vector<2x10xf32> to vector<2xf32>
    %61 = vector.shape_cast %60 : vector<2xf32> to vector<2x1xf32>
    %62 = vector.broadcast %61 : vector<2x1xf32> to vector<2x10xf32>
    %63 = arith.subf %59, %62 : vector<2x10xf32>
    %64 = math.exp %63 : vector<2x10xf32>
    %cst_50 = arith.constant dense<0.000000e+00> : vector<2xf32>
    %65 = vector.multi_reduction <add>, %64, %cst_50 [1] : vector<2x10xf32> to vector<2xf32>
    %66 = vector.shape_cast %65 : vector<2xf32> to vector<2x1xf32>
    %67 = math.log %66 : vector<2x1xf32>
    %68 = vector.broadcast %67 : vector<2x1xf32> to vector<2x10xf32>
    %69 = arith.subf %63, %68 : vector<2x10xf32>
    %c0_51 = arith.constant 0 : index
    %c0_52 = arith.constant 0 : index
    %70 = vector.load %arg9[%c0_51, %c0_52] : memref<2x10xf32, #tpu.memory_space<vmem>>, vector<2x10xf32>
    tpu.vector_store %arg9[%c0_51, %c0_52], %69 {strides = array<i32>} : memref<2x10xf32, #tpu.memory_space<vmem>>, vector<2x10xf32>,
    return
  }
}

</mosaic_0001>

<bundles_post_ra>
// kernel: simple_cnn_forward.1
= control target key start
LH: loop header
LB: loop body
LE: loop exit
PB: predicated region body
PF: predicated region fallthrough
CT: control target
= control target key end

     0   :  { %v2196_v5 = vmov 0.0   ;;  %v2197_v12 = vmov 0   ;;  %vm40_vm0 = vcmask 130048   ;;  %v2198_v22 = vmov 0.0|0.0   ;;  %s3352_s0 = inlined_call_operand.vmem [shape: f32[4,16,288], index: 0, kind: input, shape index: {}]   ;;  %s3353_s1 = inlined_call_operand.vmem [shape: f32[8,16], index: 1, kind: input, shape index: {}]   ;;  %s3354_s2 = inlined_call_operand.vmem [shape: f32[8,1], index: 2, kind: input, shape index: {}]   ;;  %s3355_s3 = inlined_call_operand.vmem [shape: f32[432,512], index: 3, kind: input, shape index: {}]   ;;  %s3356_s4 = inlined_call_operand.vmem [shape: f32[1,512], index: 4, kind: input, shape index: {}]   ;;  %s3357_s5 = inlined_call_operand.vmem [shape: f32[512,64], index: 5, kind: input, shape index: {}]   ;;  %s3358_s6 = inlined_call_operand.vmem [shape: f32[1,64], index: 6, kind: input, shape index: {}]   ;;  %s3359_s7 = inlined_call_operand.vmem [shape: f32[64,10], index: 7, kind: input, shape index: {}]   ;;  %s3360_s8 = inlined_call_operand.vmem [shape: f32[1,10], index: 8, kind: input, shape index: {}]   ;;  %s3361_s9 = inlined_call_operand.hbm [shape: f32[2,10], index: 9, kind: output, shape index: {}]  }
   0x1   :  { %v35_v0 = vld [vmem:[%s3352_s0 + $0x8] sm:$0xff]  ;;  %v38_v1 = vld [vmem:[%s3352_s0 + $0x20] sm:$0xff]  ;;  %v37_v4 = vld [vmem:[%s3352_s0 + $0x18] sm:$0xff]  ;;  %108 = vmatprep.mubr.f32.mxu1 %v2196_v5  ;;  %650 = vst [vmem:[#allocation2] sm:$0xff] %v2196_v5  ;;  %404 = vmatprep.mubr.f32.mxu0 %v2196_v5  ;;  %vm2199_vm1 = vmmov 0  }
   0x2   :  { %v34_v2 = vld [vmem:[%s3352_s0] sm:$0xff]  ;;  %v1812_v3 = vpack.c.bf16 %v38_v1, %v35_v0  ;;  %v1654_v6 = vld [vmem:[%s3352_s0 + $0x68] sm:$0xff]  ;;  %v36_v10 = vld [vmem:[%s3352_s0 + $0x10] sm:$0xff]  ;;  %2150 = vset.pattern.permute.xlu0 %v2197_v12 }
   0x3   :  { %v1814_v7 = vpack.c.bf16 %v37_v4, %v34_v2  ;;  %v2277_v8 = vld [vmem:[%s3353_s1] sm:$0xff]  ;;  %v39_v11 = vld [vmem:[%s3352_s0 + $0x28] sm:$0xff]  ;;  %v1656_v15 = vld [vmem:[%s3352_s0 + $0x78] sm:$0xff] }
   0x4   :  { %v1657_v9 = vld [vmem:[%s3352_s0 + $0x80] sm:$0xff]  ;;  %1813 = vmatprep.subr.bf16.mxu1 %v1812_v3  ;;  %v1646_v16 = vld [vmem:[%s3352_s0 + $0x38] sm:$0xff]  ;;  %v1817_v17 = vpack.c.bf16 %v39_v11, %v36_v10  ;;  %v1649_v19 = vld [vmem:[%s3352_s0 + $0x50] sm:$0xff] }
   0x5   :  { %v1826_v13 = vpack.c.bf16 %v1657_v9, %v1654_v6  ;;  %v1653_v14 = vld [vmem:[%s3352_s0 + $0x60] sm:$0xff]  ;;  %1815 = vmatpush1.bf16.msra.mxu1 %v1814_v7  ;;  %v1662_v20 = vld [vmem:[%s3352_s0 + $0x98] sm:$0xff]  ;;  %v1665_v21 = vld [vmem:[%s3352_s0 + $0xb0] sm:$0xff]  ;;  %v1819_v23 = vpack.c.bf16 %v1649_v19, %v1646_v16 }
   0x6   :  { %v1828_v18 = vpack.c.bf16 %v1656_v15, %v1653_v14  ;;  %1816 = vmatprep.subr.bf16.mxu1 %v2198_v22  ;;  %v1833_v24 = vpack.c.bf16 %v1665_v21, %v1662_v20  ;;  %v1645_v25 = vld [vmem:[%s3352_s0 + $0x30] sm:$0xff]  ;;  %v1648_v26 = vld [vmem:[%s3352_s0 + $0x48] sm:$0xff]  ;;  %v638_v31 = vld [vmem:[%s3354_s2] sm:$0xff] }
   0x7   :  { %1827 = vmatprep.subr.bf16.mxu0 %v1826_v13  ;;  %v1661_v27 = vld [vmem:[%s3352_s0 + $0x90] sm:$0xff]  ;;  %v1664_v28 = vld [vmem:[%s3352_s0 + $0xa8] sm:$0xff]  ;;  %v1821_v30 = vpack.c.bf16 %v1648_v26, %v1645_v25 }
   0x8   :  { %1829 = vmatpush1.bf16.msra.mxu0 %v1828_v18  ;;  %1643 = vmatmul.mubr.msk.f32.vlgmr.msra.gmra.mrb[0].mxu1 %vm40_vm0, %v2277_v8  ;;  %v1835_v29 = vpack.c.bf16 %v1664_v28, %v1661_v27 }
   0x9   :  { %1834 = vmatprep.subr.bf16.mxu0 %v1833_v24  ;;  %1818 = vmatpush3.bf16.msra.mxu1 %v1817_v17 }
   0xa   :  { %1769 = vmatprep.mubr.msk.f32.mxu1 %vm2199_vm1, %v2196_v5 }
   0xb   :  { %14 = vsyncpa [#allocation4], 0  ;;  %1820 = vmatprep.subr.bf16.mxu1 %v1819_v23  ;;  %1659 = vmatmul.mubr.msk.f32.vlgmr.msra.gmra.mrb[0].mxu0 %vm40_vm0, %v2277_v8  ;;  %v1647_v32 = vld [vmem:[%s3352_s0 + $0x40] sm:$0xff]  ;;  %v1650_v33 = vld [vmem:[%s3352_s0 + $0x58] sm:$0xff]  ;;  %s2201_s2 = smov 16   ;;  %s2202_s29 = smov 32  }
   0xc   :  { %1836 = vmatpush1.bf16.msra.mxu0 %v1835_v29  ;;  %552 = vmatprep.mubr.f32.mxu0 %v2196_v5  ;;  %v1824_v34 = vpack.c.bf16 %v1650_v33, %v1647_v32  ;;  %v1655_v35 = vld [vmem:[%s3352_s0 + $0x70] sm:$0xff]  ;;  %v1658_v36 = vld [vmem:[%s3352_s0 + $0x88] sm:$0xff]  ;;  %v1663_v38 = vld [vmem:[%s3352_s0 + $0xa0] sm:$0xff]  ;;  %s2203_s12 = smov 112   ;;  %vm696_vm8 = vcmask 261120   ;;  %vm723_vm10 = vcmask 916480  }
   0xd   :  { %1770 = vmatmul.mubr.msk.f32.vlgmr.msra.gmra.mrb[2].mxu1 %vm40_vm0, %v2277_v8  ;;  %641 = vperm.xlu0 %2150, %v638_v31   ;;  %v1831_v37 = vpack.c.bf16 %v1658_v36, %v1655_v35  ;;  %v1666_v39 = vld [vmem:[%s3352_s0 + $0xb8] sm:$0xff]  ;;  %v749_v41 = vld [vmem:[%s3355_s3 + $0x8] sm:$0xff]  ;;  %v748_v46 = vld [vmem:[%s3355_s3] sm:$0xff]  ;;  %vm1007_vm11 = vcmask 392192   ;;  %vm1541_vm12 = vcmask 523264   ;;  %vm1615_vm13 = vcmask 74752  }
   0xe   :  { %1822 = vmatpush1.bf16.msra.mxu1 %v1821_v30  ;;  %256 = vmatprep.mubr.f32.mxu1 %v2196_v5  ;;  %v1838_v40 = vpack.c.bf16 %v1666_v39, %v1663_v38  ;;  %v753_v42 = vld [vmem:[%s3355_s3 + $0x28] sm:$0xff]  ;;  %v751_v43 = vld [vmem:[%s3355_s3 + $0x18] sm:$0xff]  ;;  %v752_v47 = vld [vmem:[%s3355_s3 + $0x20] sm:$0xff] }
   0xf   :  { %1823 = vmatprep.subr.bf16.mxu1 %v2198_v22  ;;  %1667 = vmatmul.mubr.msk.f32.vlgmr.msra.gmra.mrb[2].mxu0 %vm40_vm0, %v2277_v8  ;;  %v1840_v44 = vpack.c.bf16 %v753_v42, %v749_v41  ;;  %v755_v45 = vld [vmem:[%s3355_s3 + $0x38] sm:$0xff]  ;;  %v1842_v49 = vpack.c.bf16 %v752_v47, %v748_v46  ;;  %v750_v50 = vld [vmem:[%s3355_s3 + $0x10] sm:$0xff]  ;;  %v757_v52 = vld [vmem:[%s3355_s3 + $0x48] sm:$0xff] }
  0x10   :  { %v1948_v48 = vpack.c.bf16 %v755_v45, %v751_v43  ;;  %v754_v51 = vld [vmem:[%s3355_s3 + $0x30] sm:$0xff]  ;;  %v761_v54 = vld [vmem:[%s3355_s3 + $0x68] sm:$0xff]  ;;  %v759_v55 = vld [vmem:[%s3355_s3 + $0x58] sm:$0xff] }
  0x11   :  { %1651 = vmatmul.mubr.msk.f32.vlgmr.msra.gmra.mrb[4].mxu1 %vm40_vm0, %v2277_v8  ;;  %1841 = vmatprep.subr.bf16.mxu0 %v1840_v44  ;;  %v1950_v53 = vpack.c.bf16 %v754_v51, %v750_v50  ;;  %v763_v56 = vld [vmem:[%s3355_s3 + $0x78] sm:$0xff]  ;;  %v1844_v57 = vpack.c.bf16 %v761_v54, %v757_v52  ;;  %v756_v59 = vld [vmem:[%s3355_s3 + $0x40] sm:$0xff]  ;;  %v758_v61 = vld [vmem:[%s3355_s3 + $0x50] sm:$0xff] }
  0x12   :  { %1825 = vmatpush3.bf16.msra.mxu1 %v1824_v34  ;;  %1776 = vmatprep.mubr.msk.f32.mxu1 %vm2199_vm1, %v2196_v5  ;;  %v1952_v58 = vpack.c.bf16 %v763_v56, %v759_v55  ;;  %v760_v60 = vld [vmem:[%s3355_s3 + $0x60] sm:$0xff]  ;;  %v762_v63 = vld [vmem:[%s3355_s3 + $0x70] sm:$0xff]  ;;  %v765_v0 = vld [vmem:[%s3355_s3 + $0x88] sm:$0xff] }
  0x13   :  { %1830 = vmatprep.subr.bf16.mxu1 %v2198_v22  ;;  %1843 = vmatpush1.bf16.msra.mxu0 %v1842_v49  ;;  %v1846_v62 = vpack.c.bf16 %v760_v60, %v756_v59  ;;  %v769_v1 = vld [vmem:[%s3355_s3 + $0xa8] sm:$0xff]  ;;  %v1954_v2 = vpack.c.bf16 %v762_v63, %v758_v61  ;;  %v767_v4 = vld [vmem:[%s3355_s3 + $0x98] sm:$0xff]  ;;  %v764_v7 = vld [vmem:[%s3355_s3 + $0x80] sm:$0xff] }
  0x14   :  { %1845 = vmatprep.subr.bf16.mxu0 %v1844_v57  ;;  %v1848_v3 = vpack.c.bf16 %v769_v1, %v765_v0  ;;  %v771_v6 = vld [vmem:[%s3355_s3 + $0xb8] sm:$0xff]  ;;  %v768_v9 = vld [vmem:[%s3355_s3 + $0xa0] sm:$0xff]  ;;  %v766_v10 = vld [vmem:[%s3355_s3 + $0x90] sm:$0xff] }
  0x15   :  { %1777 = vmatmul.mubr.msk.f32.vlgmr.msra.gmra.mrb[6].mxu1 %vm40_vm0, %v2277_v8  ;;  %v770_v11 = vld [vmem:[%s3355_s3 + $0xb0] sm:$0xff]  ;;  %v1850_v12 = vpack.c.bf16 %v768_v9, %v764_v7  ;;  %v773_v13 = vld [vmem:[%s3355_s3 + $0xc8] sm:$0xff]  ;;  %v775_v15 = vld [vmem:[%s3355_s3 + $0xd8] sm:$0xff] }
  0x16   :  { %1832 = vmatpush3.bf16.msra.mxu1 %v1831_v37  ;;  %1783 = vmatprep.mubr.msk.f32.mxu1 %vm2199_vm1, %v2196_v5  ;;  %v777_v14 = vld [vmem:[%s3355_s3 + $0xe8] sm:$0xff]  ;;  %v1958_v16 = vpack.c.bf16 %v770_v11, %v766_v10  ;;  %v779_v18 = vld [vmem:[%s3355_s3 + $0xf8] sm:$0xff]  ;;  %v772_v19 = vld [vmem:[%s3355_s3 + $0xc0] sm:$0xff] }
  0x17   :  { %1837 = vmatprep.subr.bf16.mxu1 %v2198_v22  ;;  %1847 = vmatpush1.bf16.msra.mxu0 %v1846_v62  ;;  %v1852_v17 = vpack.c.bf16 %v777_v14, %v773_v13  ;;  %v776_v20 = vld [vmem:[%s3355_s3 + $0xe0] sm:$0xff]  ;;  %v1960_v21 = vpack.c.bf16 %v779_v18, %v775_v15  ;;  %v774_v23 = vld [vmem:[%s3355_s3 + $0xd0] sm:$0xff]  ;;  %v781_v25 = vld [vmem:[%s3355_s3 + $0x108] sm:$0xff] }
  0x18   :  { %1849 = vmatprep.subr.bf16.mxu0 %v1848_v3  ;;  %v778_v24 = vld [vmem:[%s3355_s3 + $0xf0] sm:$0xff]  ;;  %v785_v26 = vld [vmem:[%s3355_s3 + $0x128] sm:$0xff]  ;;  %v783_v27 = vld [vmem:[%s3355_s3 + $0x118] sm:$0xff]  ;;  %v1854_v29 = vpack.c.bf16 %v776_v20, %v772_v19 }
  0x19   :  { %1784 = vmatmul.mubr.msk.f32.vlgmr.msra.gmra.mrb[8].mxu1 %vm40_vm0, %v2277_v8  ;;  %v787_v28 = vld [vmem:[%s3355_s3 + $0x138] sm:$0xff]  ;;  %v1962_v30 = vpack.c.bf16 %v778_v24, %v774_v23  ;;  %v1856_v31 = vpack.c.bf16 %v785_v26, %v781_v25  ;;  %v780_v32 = vld [vmem:[%s3355_s3 + $0x100] sm:$0xff]  ;;  %v782_v34 = vld [vmem:[%s3355_s3 + $0x110] sm:$0xff] }
  0x1a   :  { %1839 = vmatpush3.bf16.msra.mxu1 %v1838_v40  ;;  %1790 = vmatprep.mubr.msk.f32.mxu1 %vm2199_vm1, %v2196_v5  ;;  %v784_v33 = vld [vmem:[%s3355_s3 + $0x120] sm:$0xff]  ;;  %v1964_v35 = vpack.c.bf16 %v787_v28, %v783_v27  ;;  %v786_v36 = vld [vmem:[%s3355_s3 + $0x130] sm:$0xff]  ;;  %v789_v37 = vld [vmem:[%s3355_s3 + $0x148] sm:$0xff] }
  0x1b   :  { %1949 = vmatprep.subr.bf16.mxu1 %v1948_v48  ;;  %1851 = vmatpush1.bf16.msra.mxu0 %v1850_v12  ;;  %v793_v38 = vld [vmem:[%s3355_s3 + $0x168] sm:$0xff]  ;;  %v791_v39 = vld [vmem:[%s3355_s3 + $0x158] sm:$0xff]  ;;  %v1858_v41 = vpack.c.bf16 %v784_v33, %v780_v32  ;;  %v1966_v42 = vpack.c.bf16 %v786_v36, %v782_v34  ;;  %v788_v44 = vld [vmem:[%s3355_s3 + $0x140] sm:$0xff]  ;;  %v2200_v34 = vmov 1966171168  }
  0x1c   :  { %1853 = vmatprep.subr.bf16.mxu0 %v1852_v17  ;;  %v795_v40 = vld [vmem:[%s3355_s3 + $0x178] sm:$0xff]  ;;  %v1860_v43 = vpack.c.bf16 %v793_v38, %v789_v37  ;;  %v792_v45 = vld [vmem:[%s3355_s3 + $0x160] sm:$0xff]  ;;  %v790_v46 = vld [vmem:[%s3355_s3 + $0x150] sm:$0xff]  ;;  %v657_v38 = vlaneseq }
  0x1d   :  { %1791 = vmatmul.mubr.msk.f32.vlgmr.msra.gmra.mrb[10].mxu1 %vm40_vm0, %v2277_v8  ;;  %v1956_v8 = vpack.c.bf16 %v771_v6, %v767_v4  ;;  %v1968_v47 = vpack.c.bf16 %v795_v40, %v791_v39  ;;  %v794_v48 = vld [vmem:[%s3355_s3 + $0x170] sm:$0xff]  ;;  %v797_v49 = vld [vmem:[%s3355_s3 + $0x188] sm:$0xff]  ;;  %v799_v51 = vld [vmem:[%s3355_s3 + $0x198] sm:$0xff] }
  0x1e   :  { %1951 = vmatpush1.bf16.msra.mxu1 %v1950_v53  ;;  %v801_v50 = vld [vmem:[%s3355_s3 + $0x1a8] sm:$0xff]  ;;  %v803_v52 = vld [vmem:[%s3355_s3 + $0x1b8] sm:$0xff]  ;;  %v1862_v53 = vpack.c.bf16 %v792_v45, %v788_v44  ;;  %v1970_v54 = vpack.c.bf16 %v794_v48, %v790_v46  ;;  %v796_v56 = vld [vmem:[%s3355_s3 + $0x180] sm:$0xff]  ;;  %vm2677_vm2 = vcmp.lt.s32.totalorder %v657_v38, 144  ;;  %vm2802_vm3 = vcmp.ge.s32.totalorder %v657_v38, 16 }
  0x1f   :  { %1953 = vmatprep.subr.bf16.mxu1 %v1952_v58  ;;  %1855 = vmatpush1.bf16.msra.mxu0 %v1854_v29  ;;  %v1864_v55 = vpack.c.bf16 %v801_v50, %v797_v49  ;;  %v800_v57 = vld [vmem:[%s3355_s3 + $0x1a0] sm:$0xff]  ;;  %v798_v58 = vld [vmem:[%s3355_s3 + $0x190] sm:$0xff]  ;;  %v1972_v59 = vpack.c.bf16 %v803_v52, %v799_v51  ;;  %v805_v61 = vld [vmem:[%s3355_s3 + $0x1c8] sm:$0xff]  ;;  %vm2807_vm4 = vcmp.lt.s32.totalorder %v657_v38, 160  ;;  %vm2816_vm6 = vcmp.ge.s32.totalorder %v657_v38, 32 }
  0x20   :  { %1857 = vmatprep.subr.bf16.mxu0 %v1856_v31  ;;  %v802_v60 = vld [vmem:[%s3355_s3 + $0x1b0] sm:$0xff]  ;;  %v809_v62 = vld [vmem:[%s3355_s3 + $0x1e8] sm:$0xff]  ;;  %v807_v63 = vld [vmem:[%s3355_s3 + $0x1d8] sm:$0xff]  ;;  %v1866_v1 = vpack.c.bf16 %v800_v57, %v796_v56  ;;  %vm2821_vm7 = vcmp.lt.s32.totalorder %v657_v38, 176 }
  0x21   :  { %v811_v0 = vld [vmem:[%s3355_s3 + $0x1f8] sm:$0xff]  ;;  %v1868_v3 = vpack.c.bf16 %v809_v62, %v805_v61  ;;  %v804_v4 = vld [vmem:[%s3355_s3 + $0x1c0] sm:$0xff]  ;;  %v806_v7 = vld [vmem:[%s3355_s3 + $0x1d0] sm:$0xff] }
  0x22   :  { %1955 = vmatpush1.bf16.msra.mxu1 %v1954_v2  ;;  %v1974_v2 = vpack.c.bf16 %v802_v60, %v798_v58  ;;  %v808_v6 = vld [vmem:[%s3355_s3 + $0x1e0] sm:$0xff]  ;;  %v810_v9 = vld [vmem:[%s3355_s3 + $0x1f0] sm:$0xff]  ;;  %v813_v10 = vld [vmem:[%s3355_s3 + $0x208] sm:$0xff] }
  0x23   :  { %1957 = vmatprep.subr.bf16.mxu1 %v1956_v8  ;;  %1859 = vmatpush1.bf16.msra.mxu0 %v1858_v41  ;;  %v1976_v8 = vpack.c.bf16 %v811_v0, %v807_v63  ;;  %v817_v11 = vld [vmem:[%s3355_s3 + $0x228] sm:$0xff]  ;;  %v815_v12 = vld [vmem:[%s3355_s3 + $0x218] sm:$0xff]  ;;  %v1870_v14 = vpack.c.bf16 %v808_v6, %v804_v4  ;;  %v1978_v15 = vpack.c.bf16 %v810_v9, %v806_v7  ;;  %v812_v17 = vld [vmem:[%s3355_s3 + $0x200] sm:$0xff] }
  0x24   :  { %1861 = vmatprep.subr.bf16.mxu0 %v1860_v43  ;;  %v819_v13 = vld [vmem:[%s3355_s3 + $0x238] sm:$0xff]  ;;  %v816_v18 = vld [vmem:[%s3355_s3 + $0x220] sm:$0xff]  ;;  %v814_v20 = vld [vmem:[%s3355_s3 + $0x210] sm:$0xff] }
  0x25   :  { %v1980_v19 = vpack.c.bf16 %v819_v13, %v815_v12  ;;  %v1874_v23 = vpack.c.bf16 %v816_v18, %v812_v17  ;;  %v821_v43 = vld [vmem:[%s3355_s3 + $0x248] sm:$0xff]  ;;  %v823_v45 = vld [vmem:[%s3355_s3 + $0x258] sm:$0xff]  ;;  %v820_v50 = vld [vmem:[%s3355_s3 + $0x240] sm:$0xff] }
  0x26   :  { %1959 = vmatpush1.bf16.msra.mxu1 %v1958_v16  ;;  %v1872_v16 = vpack.c.bf16 %v817_v11, %v813_v10  ;;  %v825_v44 = vld [vmem:[%s3355_s3 + $0x268] sm:$0xff]  ;;  %v827_v49 = vld [vmem:[%s3355_s3 + $0x278] sm:$0xff]  ;;  %v824_v51 = vld [vmem:[%s3355_s3 + $0x260] sm:$0xff] }
  0x27   :  { %1961 = vmatprep.subr.bf16.mxu1 %v1960_v21  ;;  %1863 = vmatpush1.bf16.msra.mxu0 %v1862_v53  ;;  %v818_v21 = vld [vmem:[%s3355_s3 + $0x230] sm:$0xff]  ;;  %v1876_v48 = vpack.c.bf16 %v825_v44, %v821_v43  ;;  %v1878_v56 = vpack.c.bf16 %v824_v51, %v820_v50  ;;  %v829_v0 = vld [vmem:[%s3355_s3 + $0x288] sm:$0xff]  ;;  %v835_v6 = vld [vmem:[%s3355_s3 + $0x2b8] sm:$0xff] }
  0x28   :  { %1865 = vmatprep.subr.bf16.mxu0 %v1864_v55  ;;  %v1982_v24 = vpack.c.bf16 %v818_v21, %v814_v20  ;;  %v1984_v55 = vpack.c.bf16 %v827_v49, %v823_v45  ;;  %v822_v57 = vld [vmem:[%s3355_s3 + $0x250] sm:$0xff]  ;;  %v828_v7 = vld [vmem:[%s3355_s3 + $0x280] sm:$0xff]  ;;  %v841_v20 = vld [vmem:[%s3355_s3 + $0x2e8] sm:$0xff] }
  0x29   :  { %v826_v58 = vld [vmem:[%s3355_s3 + $0x270] sm:$0xff]  ;;  %v839_v21 = vld [vmem:[%s3355_s3 + $0x2d8] sm:$0xff]  ;;  %vm689_vm5 = vmand %vm2802_vm3, %vm2807_vm4 }
  0x2a   :  { %1963 = vmatpush1.bf16.msra.mxu1 %v1962_v30  ;;  %v1986_v62 = vpack.c.bf16 %v826_v58, %v822_v57  ;;  %v830_v12 = vld [vmem:[%s3355_s3 + $0x290] sm:$0xff]  ;;  %v847_v43 = vld [vmem:[%s3355_s3 + $0x318] sm:$0xff]  ;;  %v853_v57 = vld [vmem:[%s3355_s3 + $0x348] sm:$0xff] }
  0x2b   :  { %1965 = vmatprep.subr.bf16.mxu1 %v1964_v35  ;;  %1867 = vmatpush1.bf16.msra.mxu0 %v1866_v1  ;;  %v655_v35 = vunpack.c.l.s4 %v2200_v34  ;;  %v833_v1 = vld [vmem:[%s3355_s3 + $0x2a8] sm:$0xff]  ;;  %vm701_vm9 = vmand %vm2816_vm6, %vm2821_vm7 }
  0x2c   :  { %1869 = vmatprep.subr.bf16.mxu0 %v1868_v3  ;;  %v1880_v4 = vpack.c.bf16 %v833_v1, %v829_v0  ;;  %v857_v58 = vld [vmem:[%s3355_s3 + $0x368] sm:$0xff]  ;;  %v856_v0 = vld [vmem:[%s3355_s3 + $0x360] sm:$0xff] }
  0x2e   :  { %1967 = vmatpush1.bf16.msra.mxu1 %v1966_v42 }
  0x2f   :  { %1969 = vmatprep.subr.bf16.mxu1 %v1968_v47  ;;  %1871 = vmatpush1.bf16.msra.mxu0 %v1870_v14  ;;  %v656_v47 = vunpack.c.0.s8 %v655_v35  ;;  %v876_v35 = vld [vmem:[%s3355_s3 + $0x400] sm:$0xff] }
  0x30   :  { %1873 = vmatprep.subr.bf16.mxu0 %v1872_v16  ;;  %v834_v16 = vld [vmem:[%s3355_s3 + $0x2b0] sm:$0xff] }
  0x31   :  { %v1990_v18 = vpack.c.bf16 %v834_v16, %v830_v12  ;;  %v865_v12 = vld [vmem:[%s3355_s3 + $0x3a8] sm:$0xff] }
  0x32   :  { %1971 = vmatpush1.bf16.msra.mxu1 %v1970_v54  ;;  %v2608_v54 = vshrl.u32 %v657_v38, 7 }
  0x33   :  { %1973 = vmatprep.subr.bf16.mxu1 %v1972_v59  ;;  %1875 = vmatpush1.bf16.msra.mxu0 %v1874_v23 }
  0x34   :  { %1877 = vmatprep.subr.bf16.mxu0 %v1876_v48  ;;  %v2641_v11 = vsub.s32 %v656_v47, %v2608_v54  ;;  %v844_v47 = vld [vmem:[%s3355_s3 + $0x300] sm:$0xff] }
  0x35   :  { %v848_v48 = vld [vmem:[%s3355_s3 + $0x320] sm:$0xff] }
  0x36   :  { %1975 = vmatpush1.bf16.msra.mxu1 %v1974_v2  ;;  %v831_v2 = vld [vmem:[%s3355_s3 + $0x298] sm:$0xff]  ;;  %v1890_v51 = vpack.c.bf16 %v848_v48, %v844_v47  ;;  %v904_v47 = vld [vmem:[%s3355_s3 + $0x4e0] sm:$0xff] }
  0x37   :  { %1977 = vmatprep.subr.bf16.mxu1 %v1976_v8  ;;  %1879 = vmatpush1.bf16.msra.mxu0 %v1878_v56  ;;  %v832_v8 = vld [vmem:[%s3355_s3 + $0x2a0] sm:$0xff]  ;;  %v1988_v14 = vpack.c.bf16 %v835_v6, %v831_v2  ;;  %v858_v6 = vld [vmem:[%s3355_s3 + $0x370] sm:$0xff] }
  0x38   :  { %1881 = vmatprep.subr.bf16.mxu0 %v1880_v4  ;;  %v854_v4 = vld [vmem:[%s3355_s3 + $0x350] sm:$0xff] }
  0x3a   :  { %1979 = vmatpush1.bf16.msra.mxu1 %v1978_v15  ;;  %v1882_v15 = vpack.c.bf16 %v832_v8, %v828_v7  ;;  %v2002_v8 = vpack.c.bf16 %v858_v6, %v854_v4  ;;  %v878_v6 = vld [vmem:[%s3355_s3 + $0x410] sm:$0xff] }
  0x3b   :  { %1981 = vmatprep.subr.bf16.mxu1 %v1980_v19  ;;  %v837_v19 = vld [vmem:[%s3355_s3 + $0x2c8] sm:$0xff] }
  0x3c   :  { %1883 = vmatpush1.bf16.msra.mxu0 %v1882_v15  ;;  %v1884_v23 = vpack.c.bf16 %v841_v20, %v837_v19  ;;  %v864_v15 = vld [vmem:[%s3355_s3 + $0x3a0] sm:$0xff]  ;;  %v862_v19 = vld [vmem:[%s3355_s3 + $0x390] sm:$0xff] }
  0x3d   :  { %v866_v20 = vld [vmem:[%s3355_s3 + $0x3b0] sm:$0xff] }
  0x3e   :  { %1983 = vmatpush1.bf16.msra.mxu1 %v1982_v24  ;;  %v843_v24 = vld [vmem:[%s3355_s3 + $0x2f8] sm:$0xff]  ;;  %1885 = vmatprep.subr.bf16.mxu0 %v1884_v23  ;;  %v2006_v23 = vpack.c.bf16 %v866_v20, %v862_v19  ;;  %v888_v19 = vld [vmem:[%s3355_s3 + $0x460] sm:$0xff]  ;;  %v886_v20 = vld [vmem:[%s3355_s3 + $0x450] sm:$0xff] }
  0x3f   :  { %1985 = vmatprep.subr.bf16.mxu1 %v1984_v55 }
  0x42   :  { %1987 = vmatpush1.bf16.msra.mxu1 %v1986_v62  ;;  %v852_v62 = vld [vmem:[%s3355_s3 + $0x340] sm:$0xff] }
  0x43   :  { %1989 = vmatprep.subr.bf16.mxu1 %v1988_v14 }
  0x46   :  { %1991 = vmatpush1.bf16.msra.mxu1 %v1990_v18 }
  0x8c   :  { %v2587_v42 = vpop.permute.xlu0 %641 }
  0xdb   :  { %v110_v25 = vpop.f32.mrb[0].mxu1 }
  0xdc   :  { %v112_v26 = vpop.f32.mrb[1].mxu1 }
  0xde   :  { %v406_v27 = vpop.f32.mrb[0].mxu0 }
  0xdf   :  { %v408_v28 = vpop.f32.mrb[1].mxu0 }
  0xe0   :  { %v2585_v29 = vpop.f32.mrb[2].mxu1 }
  0xe1   :  { %v1771_v30 = vpop.f32.mrb[3].mxu1 }
  0xe2   :  { %v554_v31 = vpop.f32.mrb[2].mxu0 }
  0xe3   :  { %v632_v32 = vmax.f32 %v406_v27, %v554_v31  ;;  %v556_v33 = vpop.f32.mrb[3].mxu0  ;;  %v838_v31 = vld [vmem:[%s3355_s3 + $0x2d0] sm:$0xff] }
  0xe4   :  { %v258_v36 = vpop.f32.mrb[4].mxu1  ;;  %v633_v37 = vmax.f32 %v408_v28, %v556_v33 }
  0xe5   :  { %v629_v39 = vmax.f32 %v110_v25, %v258_v36  ;;  %v260_v40 = vpop.f32.mrb[5].mxu1  ;;  %v836_v25 = vld [vmem:[%s3355_s3 + $0x2c0] sm:$0xff] }
  0xe6   :  { %v630_v41 = vmax.f32 %v112_v26, %v260_v40  ;;  %v840_v26 = vld [vmem:[%s3355_s3 + $0x2e0] sm:$0xff]  ;;  %v845_v40 = vld [vmem:[%s3355_s3 + $0x308] sm:$0xff] }
  0xe7   :  { %v635_v46 = vmax.f32 %v629_v39, %v632_v32  ;;  %v1886_v30 = vpack.c.bf16 %v840_v26, %v836_v25  ;;  %v842_v32 = vld [vmem:[%s3355_s3 + $0x2f0] sm:$0xff]  ;;  %v871_v25 = vld [vmem:[%s3355_s3 + $0x3d8] sm:$0xff] }
  0xe8   :  { %v636_v52 = vmax.f32 %v630_v41, %v633_v37  ;;  %v329_v53 = vpop.f32.mrb[6].mxu1  ;;  %v1994_v36 = vpack.c.bf16 %v842_v32, %v838_v31  ;;  %v849_v41 = vld [vmem:[%s3355_s3 + $0x328] sm:$0xff]  ;;  %v875_v26 = vld [vmem:[%s3355_s3 + $0x3f8] sm:$0xff]  ;;  %v868_v31 = vld [vmem:[%s3355_s3 + $0x3c0] sm:$0xff] }
  0xe9   :  { %v644_v59 = vadd.f32 %v2587_v42, %v635_v46  ;;  %v631_v60 = vmax.f32 %v2585_v29, %v329_v53  ;;  %v1778_v61 = vpop.f32.mrb[7].mxu1  ;;  %v1992_v29 = vpack.c.bf16 %v843_v24, %v839_v21  ;;  %1887 = vmatpush1.bf16.msra.mxu0 %v1886_v30  ;;  %v1888_v45 = vpack.c.bf16 %v849_v41, %v845_v40  ;;  %v851_v46 = vld [vmem:[%s3355_s3 + $0x338] sm:$0xff]  ;;  %v850_v53 = vld [vmem:[%s3355_s3 + $0x330] sm:$0xff]  ;;  %v869_v21 = vld [vmem:[%s3355_s3 + $0x3c8] sm:$0xff] }
  0xea   :  { %v2619_v63 = vadd.f32 %v2587_v42, %v636_v52  ;;  %v1996_v50 = vpack.c.bf16 %v851_v46, %v847_v43  ;;  %v846_v52 = vld [vmem:[%s3355_s3 + $0x310] sm:$0xff]  ;;  %v859_v61 = vld [vmem:[%s3355_s3 + $0x378] sm:$0xff]  ;;  %v873_v24 = vld [vmem:[%s3355_s3 + $0x3e8] sm:$0xff]  ;;  %v2008_v30 = vpack.c.bf16 %v875_v26, %v871_v25 }
  0xeb   :  { %v647_v3 = vmax.f32 %v644_v59, 0.0  ;;  %1993 = vmatprep.subr.bf16.mxu1 %v1992_v29  ;;  %1889 = vmatprep.subr.bf16.mxu0 %v1888_v45  ;;  %v1998_v56 = vpack.c.bf16 %v850_v53, %v846_v52  ;;  %v855_v59 = vld [vmem:[%s3355_s3 + $0x358] sm:$0xff]  ;;  %v1900_v29 = vpack.c.bf16 %v873_v24, %v869_v21  ;;  %v872_v32 = vld [vmem:[%s3355_s3 + $0x3e0] sm:$0xff]  ;;  %v877_v41 = vld [vmem:[%s3355_s3 + $0x408] sm:$0xff] }
  0xec   :  { %v648_v9 = vmax.f32 %v2619_v63, 0.0  ;;  %v477_v10 = vpop.f32.mrb[8].mxu1  ;;  %1995 = vmatpush1.bf16.msra.mxu1 %v1994_v36  ;;  %v2000_v2 = vpack.c.bf16 %v859_v61, %v855_v59  ;;  %v867_v63 = vld [vmem:[%s3355_s3 + $0x3b8] sm:$0xff]  ;;  %v881_v43 = vld [vmem:[%s3355_s3 + $0x428] sm:$0xff]  ;;  %v890_v21 = vld [vmem:[%s3355_s3 + $0x470] sm:$0xff] }
  0xed   :  { %v1785_v13 = vpop.f32.mrb[9].mxu1  ;;  %1997 = vmatprep.subr.bf16.mxu1 %v1996_v50  ;;  %1891 = vmatpush1.bf16.msra.mxu0 %v1890_v51  ;;  %v883_v45 = vld [vmem:[%s3355_s3 + $0x438] sm:$0xff]  ;;  %v906_v51 = vld [vmem:[%s3355_s3 + $0x4f0] sm:$0xff]  ;;  %v909_v52 = vld [vmem:[%s3355_s3 + $0x508] sm:$0xff] }
  0xee   :  { %v653_v17 = vcombine.low %v647_v3, %v648_v9  ;;  %v1894_v3 = vpack.c.bf16 %v856_v0, %v852_v62  ;;  %v863_v13 = vld [vmem:[%s3355_s3 + $0x398] sm:$0xff] }
  0xf0   :  { %v625_v27 = vpop.f32.mrb[10].mxu1  ;;  %v660_v28 = vrot.slane %v653_v17, %v2641_v11  ;;  %1999 = vmatpush1.bf16.msra.mxu1 %v1998_v56  ;;  %v2004_v17 = vpack.c.bf16 %v867_v63, %v863_v13  ;;  %v889_v13 = vld [vmem:[%s3355_s3 + $0x468] sm:$0xff]  ;;  %v891_v63 = vld [vmem:[%s3355_s3 + $0x478] sm:$0xff] }
  0xf1   :  { %v634_v33 = vmax.f32 %v477_v10, %v625_v27  ;;  %v1792_v34 = vpop.f32.mrb[11].mxu1  ;;  %v861_v10 = vld [vmem:[%s3355_s3 + $0x388] sm:$0xff]  ;;  %2001 = vmatprep.subr.bf16.mxu1 %v2000_v2 }
  0xf2   :  { %v674_v37 = vcombine.high %v660_v28, %v660_v28  ;;  %v667_v39 = vrot.slane %v660_v28, %v2641_v11  ;;  %v1896_v14 = vpack.c.bf16 %v865_v12, %v861_v10  ;;  %v874_v34 = vld [vmem:[%s3355_s3 + $0x3f0] sm:$0xff]  ;;  %v885_v12 = vld [vmem:[%s3355_s3 + $0x448] sm:$0xff] }
  0xf3   :  { %v637_v44 = vmax.f32 %v631_v60, %v634_v33  ;;  %v870_v33 = vld [vmem:[%s3355_s3 + $0x3d0] sm:$0xff]  ;;  %v1908_v25 = vpack.c.bf16 %v889_v13, %v885_v12 }
  0xf4   :  { %v681_v49 = vrot.slane %v674_v37, %v2641_v11  ;;  %673 = vst.msk [vmem:[#allocation2] ss:$2 sm:$0x3] %vm2677_vm2, %v667_v39  ;;  %v692_v1 = vcombine.high %v667_v39, %v667_v39  ;;  %2003 = vmatpush1.bf16.msra.mxu1 %v2002_v8  ;;  %v1902_v37 = vpack.c.bf16 %v872_v32, %v868_v31  ;;  %v892_v32 = vld [vmem:[%s3355_s3 + $0x480] sm:$0xff]  ;;  %v918_v12 = vld [vmem:[%s3355_s3 + $0x550] sm:$0xff] }
  0xf5   :  { %v646_v55 = vadd.f32 %v2587_v42, %v637_v44  ;;  %v1892_v42 = vpack.c.bf16 %v857_v58, %v853_v57  ;;  %2005 = vmatprep.subr.bf16.mxu1 %v2004_v17  ;;  %v2010_v39 = vpack.c.bf16 %v874_v34, %v870_v33  ;;  %v1904_v44 = vpack.c.bf16 %v881_v43, %v877_v41  ;;  %v896_v33 = vld [vmem:[%s3355_s3 + $0x4a0] sm:$0xff]  ;;  %v905_v41 = vld [vmem:[%s3355_s3 + $0x4e8] sm:$0xff]  ;;  %v903_v43 = vld [vmem:[%s3355_s3 + $0x4d8] sm:$0xff] }
  0xf6   :  { %682 = vrot.lane.b32.xlu1 %v681_v49, %s2201_s2  ;;  %v2018_v31 = vpack.c.bf16 %v890_v21, %v886_v20  ;;  %v922_v13 = vld [vmem:[%s3355_s3 + $0x570] sm:$0xff]  ;;  %v928_v20 = vld [vmem:[%s3355_s3 + $0x5a0] sm:$0xff] }
  0xf7   :  { %v649_v60 = vmax.f32 %v646_v55, 0.0  ;;  %1893 = vmatprep.subr.bf16.mxu0 %v1892_v42  ;;  %v2204_v42 = vmov 1983009808  }
  0xf8   :  { %1895 = vmatpush1.bf16.msra.mxu0 %v1894_v3  ;;  %2007 = vmatpush1.bf16.msra.mxu1 %v2006_v23  ;;  %v989_v61 = vunpack.c.l.s4 %v2204_v42  ;;  %v880_v3 = vld [vmem:[%s3355_s3 + $0x420] sm:$0xff]  ;;  %v893_v23 = vld [vmem:[%s3355_s3 + $0x488] sm:$0xff] }
  0xf9   :  { %v705_v7 = vcombine.low %v648_v9, %v649_v60  ;;  %v860_v9 = vld [vmem:[%s3355_s3 + $0x380] sm:$0xff]  ;;  %1897 = vmatprep.subr.bf16.mxu0 %v1896_v14  ;;  %2009 = vmatprep.subr.bf16.mxu1 %v2008_v30  ;;  %v887_v14 = vld [vmem:[%s3355_s3 + $0x458] sm:$0xff] }
  0xfa   :  { %693 = vrot.lane.b32.xlu1 %v692_v1, %s2202_s29  ;;  %v1898_v18 = vpack.c.bf16 %v864_v15, %v860_v9  ;;  %v990_v1 = vunpack.c.0.s8 %v989_v61  ;;  %v1906_v15 = vpack.c.bf16 %v880_v3, %v876_v35  ;;  %v2016_v26 = vpack.c.bf16 %v891_v63, %v887_v14  ;;  %v910_v61 = vld [vmem:[%s3355_s3 + $0x510] sm:$0xff]  ;;  %v923_v35 = vld [vmem:[%s3355_s3 + $0x578] sm:$0xff]  ;;  %v925_v14 = vld [vmem:[%s3355_s3 + $0x588] sm:$0xff] }
  0xfb   :  { %v712_v16 = vrot.slane %v705_v7, %v2641_v11  ;;  %v882_v7 = vld [vmem:[%s3355_s3 + $0x430] sm:$0xff]  ;;  %v929_v63 = vld [vmem:[%s3355_s3 + $0x5a8] sm:$0xff] }
  0xfc   :  { %1899 = vmatpush1.bf16.msra.mxu0 %v1898_v18  ;;  %2011 = vmatpush1.bf16.msra.mxu1 %v2010_v39  ;;  %v993_v2 = vsub.s32 %v990_v1, %v2608_v54  ;;  %v884_v18 = vld [vmem:[%s3355_s3 + $0x440] sm:$0xff]  ;;  %v898_v39 = vld [vmem:[%s3355_s3 + $0x4b0] sm:$0xff]  ;;  %v921_v1 = vld [vmem:[%s3355_s3 + $0x568] sm:$0xff]  ;;  %v1928_v21 = vpack.c.bf16 %v929_v63, %v925_v14 }
  0xfd   :  { %v719_v27 = vrot.slane %v712_v16, %v2641_v11  ;;  %v728_v28 = vcombine.high %v712_v16, %v712_v16  ;;  %1901 = vmatprep.subr.bf16.mxu0 %v1900_v29  ;;  %v2014_v16 = vpack.c.bf16 %v882_v7, %v878_v6  ;;  %v899_v29 = vld [vmem:[%s3355_s3 + $0x4b8] sm:$0xff]  ;;  %v1910_v30 = vpack.c.bf16 %v888_v19, %v884_v18  ;;  %v916_v6 = vld [vmem:[%s3355_s3 + $0x540] sm:$0xff] }
  0xfe   :  { %v920_v7 = vld [vmem:[%s3355_s3 + $0x560] sm:$0xff]  ;;  %v2034_v18 = vpack.c.bf16 %v922_v13, %v918_v12  ;;  %v958_v12 = vld [vmem:[%s3355_s3 + $0x690] sm:$0xff] }
  0xff   :  { %v735_v36 = vrot.slane %v728_v28, %v2641_v11  ;;  %720 = vrot.lane.b32.xlu0 %v719_v27, %s2203_s12  ;;  %v739_v40 = vcombine.high %v719_v27, %v719_v27  ;;  %v879_v11 = vld [vmem:[%s3355_s3 + $0x418] sm:$0xff]  ;;  %v897_v27 = vld [vmem:[%s3355_s3 + $0x4a8] sm:$0xff]  ;;  %v924_v19 = vld [vmem:[%s3355_s3 + $0x580] sm:$0xff] }
 0x100   :  { %1903 = vmatpush1.bf16.msra.mxu0 %v1902_v37  ;;  %v2012_v46 = vpack.c.bf16 %v883_v45, %v879_v11  ;;  %v895_v28 = vld [vmem:[%s3355_s3 + $0x498] sm:$0xff]  ;;  %v1912_v34 = vpack.c.bf16 %v897_v27, %v893_v23  ;;  %v894_v37 = vld [vmem:[%s3355_s3 + $0x490] sm:$0xff]  ;;  %v937_v27 = vld [vmem:[%s3355_s3 + $0x5e8] sm:$0xff] }
 0x101   :  { %1905 = vmatprep.subr.bf16.mxu0 %v1904_v44  ;;  %v907_v11 = vld [vmem:[%s3355_s3 + $0x4f8] sm:$0xff]  ;;  %v1914_v44 = vpack.c.bf16 %v896_v33, %v892_v32  ;;  %v2022_v45 = vpack.c.bf16 %v898_v39, %v894_v37  ;;  %v932_v32 = vld [vmem:[%s3355_s3 + $0x5c0] sm:$0xff]  ;;  %v934_v37 = vld [vmem:[%s3355_s3 + $0x5d0] sm:$0xff] }
 0x102   :  { %2013 = vmatprep.subr.bf16.mxu1 %v2012_v46  ;;  %v900_v46 = vld [vmem:[%s3355_s3 + $0x4c0] sm:$0xff]  ;;  %v938_v39 = vld [vmem:[%s3355_s3 + $0x5f0] sm:$0xff] }
 0x103   :  { %740 = vrot.lane.b32.xlu0 %v739_v40, %s2201_s2  ;;  %v901_v40 = vld [vmem:[%s3355_s3 + $0x4c8] sm:$0xff]  ;;  %v936_v33 = vld [vmem:[%s3355_s3 + $0x5e0] sm:$0xff]  ;;  %v962_v13 = vld [vmem:[%s3355_s3 + $0x6b0] sm:$0xff] }
 0x104   :  { %v1916_v48 = vpack.c.bf16 %v905_v41, %v901_v40  ;;  %v941_v40 = vld [vmem:[%s3355_s3 + $0x608] sm:$0xff]  ;;  %v2054_v63 = vpack.c.bf16 %v962_v13, %v958_v12  ;;  %v1354_v12 = vld [vmem:[%s3357_s5 + $0x140] sm:$0xff] }
 0x105   :  { %v945_v41 = vld [vmem:[%s3355_s3 + $0x628] sm:$0xff] }
 0x106   :  { %v1355_v13 = vld [vmem:[%s3357_s5 + $0x148] sm:$0xff] }
 0x168   :  { %v683_v49 = vpop.permute.xlu1 %682 }
 0x169   :  { %v684_v50 = vrot.slane %v683_v49, 7 }
 0x16b   :  { %v685_v53 = vsel %vm40_vm0, %v684_v50, %v683_v49  ;;  %v2024_v49 = vpack.c.bf16 %v907_v11, %v903_v43  ;;  %v902_v50 = vld [vmem:[%s3355_s3 + $0x4d0] sm:$0xff]  ;;  %v943_v43 = vld [vmem:[%s3355_s3 + $0x618] sm:$0xff] }
 0x16c   :  { %691 = vst.msk [vmem:[#allocation2 + $0x2] ss:$2 sm:$0x3] %vm689_vm5, %v685_v53  ;;  %v694_v55 = vpop.permute.xlu1 %693  ;;  %v913_v53 = vld [vmem:[%s3355_s3 + $0x528] sm:$0xff]  ;;  %v947_v11 = vld [vmem:[%s3355_s3 + $0x638] sm:$0xff] }
 0x16d   :  { %v695_v56 = vrot.slane %v694_v55, 7 }
 0x16f   :  { %v697_v38 = vsel %vm696_vm8, %v695_v56, %v694_v55  ;;  %v911_v55 = vld [vmem:[%s3355_s3 + $0x518] sm:$0xff] }
 0x170   :  { %703 = vst.msk [vmem:[#allocation2 + $0x4] ss:$2 sm:$0x3] %vm701_vm9, %v697_v38  ;;  %v915_v56 = vld [vmem:[%s3355_s3 + $0x538] sm:$0xff]  ;;  %v1918_v38 = vpack.c.bf16 %v904_v47, %v900_v46  ;;  %v940_v46 = vld [vmem:[%s3355_s3 + $0x600] sm:$0xff] }
 0x171   :  { %v721_v57 = vpop.permute.xlu0 %720  ;;  %v2028_v42 = vpack.c.bf16 %v915_v56, %v911_v55  ;;  %v944_v47 = vld [vmem:[%s3355_s3 + $0x620] sm:$0xff]  ;;  %v951_v55 = vld [vmem:[%s3355_s3 + $0x658] sm:$0xff] }
 0x172   :  { %v722_v58 = vrot.slane %v721_v57, 1  ;;  %v955_v56 = vld [vmem:[%s3355_s3 + $0x678] sm:$0xff] }
 0x174   :  { %v724_v59 = vsel %vm723_vm10, %v721_v57, %v722_v58  ;;  %v2026_v57 = vpack.c.bf16 %v906_v51, %v902_v50  ;;  %v908_v58 = vld [vmem:[%s3355_s3 + $0x500] sm:$0xff]  ;;  %v942_v50 = vld [vmem:[%s3355_s3 + $0x610] sm:$0xff] }
 0x175   :  { %727 = vst.msk [vmem:[#allocation2 + $0x1] ss:$2 sm:$0x3] %vm2677_vm2, %v724_v59  ;;  %v741_v60 = vpop.permute.xlu0 %740  ;;  %v912_v59 = vld [vmem:[%s3355_s3 + $0x520] sm:$0xff]  ;;  %v946_v51 = vld [vmem:[%s3355_s3 + $0x630] sm:$0xff] }
 0x176   :  { %738 = vst.msk [vmem:[#allocation2 + $0x3] ss:$2 sm:$0x3] %vm689_vm5, %v735_v36  ;;  %v742_v62 = vrot.slane %v741_v60, 7  ;;  %v2020_v36 = vpack.c.bf16 %v899_v29, %v895_v28  ;;  %v1922_v3 = vpack.c.bf16 %v912_v59, %v908_v58  ;;  %v935_v28 = vld [vmem:[%s3355_s3 + $0x5d8] sm:$0xff]  ;;  %v948_v58 = vld [vmem:[%s3355_s3 + $0x640] sm:$0xff] }
 0x177   :  { %v939_v29 = vld [vmem:[%s3355_s3 + $0x5f8] sm:$0xff]  ;;  %v952_v59 = vld [vmem:[%s3355_s3 + $0x660] sm:$0xff] }
 0x178   :  { %v743_v0 = vsel %vm40_vm0, %v742_v62, %v741_v60  ;;  %v1920_v60 = vpack.c.bf16 %v913_v53, %v909_v52  ;;  %v914_v62 = vld [vmem:[%s3355_s3 + $0x530] sm:$0xff]  ;;  %v949_v52 = vld [vmem:[%s3355_s3 + $0x648] sm:$0xff] }
 0x179   :  { %746 = vst.msk [vmem:[#allocation2 + $0x5] ss:$2 sm:$0x3] %vm701_vm9, %v743_v0  ;;  %v917_v0 = vld [vmem:[%s3355_s3 + $0x548] sm:$0xff] }
 0x17a   :  { %v953_v53 = vld [vmem:[%s3355_s3 + $0x668] sm:$0xff] }
 0x180   :  { %v747_v4 = vld [vmem:[#allocation2] sm:$0xff] }
 0x181   :  { %v987_v8 = vcombine.high %v747_v4, %v747_v4  ;;  %v994_v10 = vrot.slane %v747_v4, %v993_v2  ;;  %v2030_v4 = vpack.c.bf16 %v914_v62, %v910_v61  ;;  %v950_v61 = vld [vmem:[%s3355_s3 + $0x650] sm:$0xff] }
 0x182   :  { %v954_v62 = vld [vmem:[%s3355_s3 + $0x670] sm:$0xff] }
 0x183   :  { %v1002_v9 = vcombine.high %v994_v10, %v994_v10  ;;  %v2868_v17 = vrot.slane %v987_v8, %v993_v2  ;;  %v919_v2 = vld [vmem:[%s3355_s3 + $0x558] sm:$0xff]  ;;  %v1924_v8 = vpack.c.bf16 %v921_v1, %v917_v0  ;;  %v957_v0 = vld [vmem:[%s3355_s3 + $0x688] sm:$0xff] }
 0x184   :  { %v961_v1 = vld [vmem:[%s3355_s3 + $0x6a8] sm:$0xff] }
 0x185   :  { %1074 = vmatprep.mubr.f32.mxu0 %v1002_v9  ;;  %1216 = vmatprep.mubr.f32.mxu1 %v1002_v9  ;;  %v1003_v24 = vcombine.high %v2868_v17, %v2868_v17  ;;  %v927_v9 = vld [vmem:[%s3355_s3 + $0x598] sm:$0xff] }
 0x186   :  { %1075 = vmatmul.mubr.f32.vlgmr.msra.gmra.mrb[4].mxu0 %v994_v10  ;;  %1217 = vmatmul.mubr.f32.vlgmr.msra.gmra.mrb[12].mxu1 %v994_v10  ;;  %v2032_v10 = vpack.c.bf16 %v923_v35, %v919_v2  ;;  %v959_v2 = vld [vmem:[%s3355_s3 + $0x698] sm:$0xff] }
 0x187   :  { %1907 = vmatpush1.bf16.msra.mxu0 %v1906_v15  ;;  %2015 = vmatpush1.bf16.msra.mxu1 %v2014_v16  ;;  %v931_v15 = vld [vmem:[%s3355_s3 + $0x5b8] sm:$0xff]  ;;  %v1926_v16 = vpack.c.bf16 %v920_v7, %v916_v6  ;;  %v956_v6 = vld [vmem:[%s3355_s3 + $0x680] sm:$0xff]  ;;  %v1944_v7 = vpack.c.bf16 %v961_v1, %v957_v0 }
 0x188   :  { %1669 = vmatprep.mubr.msk.f32.mxu0 %vm1007_vm11, %v1003_v24  ;;  %1670 = vmatprep.mubr.msk.f32.mxu1 %vm1007_vm11, %v1003_v24  ;;  %v2036_v23 = vpack.c.bf16 %v931_v15, %v927_v9  ;;  %v926_v24 = vld [vmem:[%s3355_s3 + $0x590] sm:$0xff]  ;;  %v963_v35 = vld [vmem:[%s3355_s3 + $0x6b8] sm:$0xff]  ;;  %v1330_v9 = vld [vmem:[%s3357_s5 + $0x80] sm:$0xff] }
 0x189   :  { %1909 = vmatprep.subr.bf16.mxu0 %v1908_v25  ;;  %2017 = vmatprep.subr.bf16.mxu1 %v2016_v26  ;;  %v930_v25 = vld [vmem:[%s3355_s3 + $0x5b0] sm:$0xff]  ;;  %v933_v26 = vld [vmem:[%s3355_s3 + $0x5c8] sm:$0xff]  ;;  %v1338_v1 = vld [vmem:[%s3357_s5 + $0xc0] sm:$0xff] }
 0x18a   :  { %v1331_v15 = vld [vmem:[%s3357_s5 + $0x88] sm:$0xff] }
 0x18b   :  { %1911 = vmatpush1.bf16.msra.mxu0 %v1910_v30  ;;  %2019 = vmatpush1.bf16.msra.mxu1 %v2018_v31  ;;  %v1930_v30 = vpack.c.bf16 %v928_v20, %v924_v19  ;;  %v2038_v31 = vpack.c.bf16 %v930_v25, %v926_v24  ;;  %v1363_v19 = vld [vmem:[%s3357_s5 + $0x188] sm:$0xff]  ;;  %v1346_v24 = vld [vmem:[%s3357_s5 + $0x100] sm:$0xff] }
 0x18c   :  { %1913 = vmatprep.subr.bf16.mxu0 %v1912_v34  ;;  %2021 = vmatprep.subr.bf16.mxu1 %v2020_v36  ;;  %v1932_v34 = vpack.c.bf16 %v937_v27, %v933_v26  ;;  %v2040_v36 = vpack.c.bf16 %v939_v29, %v935_v28  ;;  %v1315_v20 = vld [vmem:[%s3357_s5 + $0x8] sm:$0xff]  ;;  %v1332_v27 = vld [vmem:[%s3357_s5 + $0x90] sm:$0xff]  ;;  %v1333_v28 = vld [vmem:[%s3357_s5 + $0x98] sm:$0xff] }
 0x18d   :  { %v1347_v25 = vld [vmem:[%s3357_s5 + $0x108] sm:$0xff]  ;;  %v1364_v29 = vld [vmem:[%s3357_s5 + $0x190] sm:$0xff] }
 0x18e   :  { %v2090_v26 = vpack.c.bf16 %v1347_v25, %v1346_v24  ;;  %v1357_v24 = vld [vmem:[%s3357_s5 + $0x158] sm:$0xff] }
 0x18f   :  { %1915 = vmatpush1.bf16.msra.mxu0 %v1914_v44  ;;  %2023 = vmatpush1.bf16.msra.mxu1 %v2022_v45  ;;  %v1934_v44 = vpack.c.bf16 %v936_v33, %v932_v32  ;;  %v2042_v45 = vpack.c.bf16 %v938_v39, %v934_v37  ;;  %v1316_v32 = vld [vmem:[%s3357_s5 + $0x10] sm:$0xff]  ;;  %v1317_v33 = vld [vmem:[%s3357_s5 + $0x18] sm:$0xff] }
 0x190   :  { %1917 = vmatprep.subr.bf16.mxu0 %v1916_v48  ;;  %2025 = vmatprep.subr.bf16.mxu1 %v2024_v49  ;;  %v1936_v48 = vpack.c.bf16 %v945_v41, %v941_v40  ;;  %v2044_v49 = vpack.c.bf16 %v947_v11, %v943_v43  ;;  %v1348_v37 = vld [vmem:[%s3357_s5 + $0x110] sm:$0xff]  ;;  %v1349_v39 = vld [vmem:[%s3357_s5 + $0x118] sm:$0xff]  ;;  %v1334_v41 = vld [vmem:[%s3357_s5 + $0xa0] sm:$0xff] }
 0x191   :  { %v2094_v40 = vpack.c.bf16 %v1349_v39, %v1348_v37  ;;  %v1335_v43 = vld [vmem:[%s3357_s5 + $0xa8] sm:$0xff]  ;;  %v1366_v11 = vld [vmem:[%s3357_s5 + $0x1a0] sm:$0xff]  ;;  %v1344_v39 = vld [vmem:[%s3357_s5 + $0xf0] sm:$0xff] }
 0x192   :  { %v1359_v37 = vld [vmem:[%s3357_s5 + $0x168] sm:$0xff] }
 0x193   :  { %1919 = vmatpush1.bf16.msra.mxu0 %v1918_v38  ;;  %2027 = vmatpush1.bf16.msra.mxu1 %v2026_v57  ;;  %v1938_v38 = vpack.c.bf16 %v944_v47, %v940_v46  ;;  %v2046_v57 = vpack.c.bf16 %v946_v51, %v942_v50  ;;  %v1318_v46 = vld [vmem:[%s3357_s5 + $0x20] sm:$0xff]  ;;  %v1319_v47 = vld [vmem:[%s3357_s5 + $0x28] sm:$0xff] }
 0x194   :  { %1921 = vmatprep.subr.bf16.mxu0 %v1920_v60  ;;  %2029 = vmatprep.subr.bf16.mxu1 %v2028_v42  ;;  %v1940_v60 = vpack.c.bf16 %v953_v53, %v949_v52  ;;  %v2048_v42 = vpack.c.bf16 %v955_v56, %v951_v55  ;;  %v1350_v50 = vld [vmem:[%s3357_s5 + $0x120] sm:$0xff]  ;;  %v1351_v51 = vld [vmem:[%s3357_s5 + $0x128] sm:$0xff]  ;;  %v1336_v53 = vld [vmem:[%s3357_s5 + $0xb0] sm:$0xff] }
 0x195   :  { %v2098_v52 = vpack.c.bf16 %v1351_v51, %v1350_v50  ;;  %v1337_v55 = vld [vmem:[%s3357_s5 + $0xb8] sm:$0xff]  ;;  %v1368_v56 = vld [vmem:[%s3357_s5 + $0x1b0] sm:$0xff] }
 0x196   :  { %v1361_v50 = vld [vmem:[%s3357_s5 + $0x178] sm:$0xff] }
 0x197   :  { %1923 = vmatpush1.bf16.msra.mxu0 %v1922_v3  ;;  %2031 = vmatpush1.bf16.msra.mxu1 %v2030_v4  ;;  %v1942_v3 = vpack.c.bf16 %v952_v59, %v948_v58  ;;  %v2050_v4 = vpack.c.bf16 %v954_v62, %v950_v61  ;;  %v1320_v58 = vld [vmem:[%s3357_s5 + $0x30] sm:$0xff]  ;;  %v1321_v59 = vld [vmem:[%s3357_s5 + $0x38] sm:$0xff] }
 0x198   :  { %1925 = vmatprep.subr.bf16.mxu0 %v1924_v8  ;;  %2033 = vmatprep.subr.bf16.mxu1 %v2032_v10  ;;  %v2052_v8 = vpack.c.bf16 %v963_v35, %v959_v2  ;;  %v960_v10 = vld [vmem:[%s3355_s3 + $0x6a0] sm:$0xff]  ;;  %v1352_v61 = vld [vmem:[%s3357_s5 + $0x130] sm:$0xff]  ;;  %v1353_v62 = vld [vmem:[%s3357_s5 + $0x138] sm:$0xff] }
 0x199   :  { %v1946_v14 = vpack.c.bf16 %v960_v10, %v956_v6  ;;  %v2102_v0 = vpack.c.bf16 %v1353_v62, %v1352_v61  ;;  %v1339_v2 = vld [vmem:[%s3357_s5 + $0xc8] sm:$0xff]  ;;  %v1370_v35 = vld [vmem:[%s3357_s5 + $0x1c0] sm:$0xff] }
 0x19a   :  { %v1322_v6 = vld [vmem:[%s3357_s5 + $0x40] sm:$0xff] }
 0x19b   :  { %1927 = vmatpush1.bf16.msra.mxu0 %v1926_v16  ;;  %2035 = vmatpush1.bf16.msra.mxu1 %v2034_v18  ;;  %v1362_v16 = vld [vmem:[%s3357_s5 + $0x180] sm:$0xff]  ;;  %v2056_v18 = vpack.c.bf16 %v1331_v15, %v1330_v9  ;;  %v1341_v9 = vld [vmem:[%s3357_s5 + $0xd8] sm:$0xff]  ;;  %v1372_v15 = vld [vmem:[%s3357_s5 + $0x1d0] sm:$0xff] }
 0x19c   :  { %1929 = vmatprep.subr.bf16.mxu0 %v1928_v21  ;;  %2037 = vmatprep.subr.bf16.mxu1 %v2036_v23  ;;  %v2088_v21 = vpack.c.bf16 %v1363_v19, %v1362_v16  ;;  %v1324_v19 = vld [vmem:[%s3357_s5 + $0x50] sm:$0xff] }
 0x19f   :  { %1931 = vmatpush1.bf16.msra.mxu0 %v1930_v30  ;;  %2039 = vmatpush1.bf16.msra.mxu1 %v2038_v31  ;;  %v2060_v30 = vpack.c.bf16 %v1333_v28, %v1332_v27  ;;  %v1365_v31 = vld [vmem:[%s3357_s5 + $0x198] sm:$0xff]  ;;  %v1343_v27 = vld [vmem:[%s3357_s5 + $0xe8] sm:$0xff]  ;;  %v1374_v28 = vld [vmem:[%s3357_s5 + $0x1e0] sm:$0xff] }
 0x1a0   :  { %1933 = vmatprep.subr.bf16.mxu0 %v1932_v34  ;;  %2041 = vmatprep.subr.bf16.mxu1 %v2040_v36  ;;  %v2092_v34 = vpack.c.bf16 %v1365_v31, %v1364_v29  ;;  %v2062_v36 = vpack.c.bf16 %v1317_v33, %v1316_v32  ;;  %v1326_v31 = vld [vmem:[%s3357_s5 + $0x60] sm:$0xff]  ;;  %v1327_v32 = vld [vmem:[%s3357_s5 + $0x68] sm:$0xff] }
 0x1a3   :  { %1935 = vmatpush1.bf16.msra.mxu0 %v1934_v44  ;;  %2043 = vmatpush1.bf16.msra.mxu1 %v2042_v45  ;;  %v2064_v44 = vpack.c.bf16 %v1335_v43, %v1334_v41  ;;  %v1367_v45 = vld [vmem:[%s3357_s5 + $0x1a8] sm:$0xff]  ;;  %v1345_v41 = vld [vmem:[%s3357_s5 + $0xf8] sm:$0xff]  ;;  %v1376_v43 = vld [vmem:[%s3357_s5 + $0x1f0] sm:$0xff] }
 0x1a4   :  { %1937 = vmatprep.subr.bf16.mxu0 %v1936_v48  ;;  %2045 = vmatprep.subr.bf16.mxu1 %v2044_v49  ;;  %v2096_v48 = vpack.c.bf16 %v1367_v45, %v1366_v11  ;;  %v2066_v49 = vpack.c.bf16 %v1319_v47, %v1318_v46  ;;  %v1377_v11 = vld [vmem:[%s3357_s5 + $0x1f8] sm:$0xff]  ;;  %v1328_v46 = vld [vmem:[%s3357_s5 + $0x70] sm:$0xff] }
 0x1a5   :  { %v2116_v45 = vpack.c.bf16 %v1377_v11, %v1376_v43  ;;  %v1329_v47 = vld [vmem:[%s3357_s5 + $0x78] sm:$0xff] }
 0x1a7   :  { %1939 = vmatpush1.bf16.msra.mxu0 %v1938_v38  ;;  %2047 = vmatpush1.bf16.msra.mxu1 %v2046_v57  ;;  %v2068_v38 = vpack.c.bf16 %v1337_v55, %v1336_v53  ;;  %v1369_v57 = vld [vmem:[%s3357_s5 + $0x1b8] sm:$0xff]  ;;  %v976_v53 = vsub.s32 2, %v2608_v54  ;;  %v964_v55 = vld [vmem:[%s3356_s4] sm:$0xf] }
 0x1a8   :  { %1941 = vmatprep.subr.bf16.mxu0 %v1940_v60  ;;  %2049 = vmatprep.subr.bf16.mxu1 %v2048_v42  ;;  %v2100_v60 = vpack.c.bf16 %v1369_v57, %v1368_v56  ;;  %v2070_v42 = vpack.c.bf16 %v1321_v59, %v1320_v58  ;;  %v972_v56 = vsub.s32 1, %v2608_v54 }
 0x1a9   :  { %v977_v58 = vrot.slane %v964_v55, %v976_v53 }
 0x1aa   :  { %v973_v59 = vrot.slane %v964_v55, %v972_v56 }
 0x1ab   :  { %1943 = vmatpush1.bf16.msra.mxu0 %v1942_v3  ;;  %2051 = vmatpush1.bf16.msra.mxu1 %v2050_v4  ;;  %v2072_v3 = vpack.c.bf16 %v1339_v2, %v1338_v1  ;;  %v1371_v4 = vld [vmem:[%s3357_s5 + $0x1c8] sm:$0xff] }
 0x1ac   :  { %1945 = vmatprep.subr.bf16.mxu0 %v1944_v7  ;;  %2053 = vmatprep.subr.bf16.mxu1 %v2052_v8  ;;  %v1323_v7 = vld [vmem:[%s3357_s5 + $0x48] sm:$0xff]  ;;  %v2104_v8 = vpack.c.bf16 %v1371_v4, %v1370_v35 }
 0x1ad   :  { %v2074_v10 = vpack.c.bf16 %v1323_v7, %v1322_v6 }
 0x1af   :  { %1947 = vmatpush1.bf16.msra.mxu0 %v1946_v14  ;;  %2055 = vmatpush1.bf16.msra.mxu1 %v2054_v63  ;;  %v2106_v14 = vpack.c.bf16 %v1355_v13, %v1354_v12  ;;  %v1340_v63 = vld [vmem:[%s3357_s5 + $0xd0] sm:$0xff] }
 0x1b0   :  { %2057 = vmatprep.subr.bf16.mxu0 %v2056_v18  ;;  %2089 = vmatprep.subr.bf16.mxu1 %v2088_v21  ;;  %v2076_v16 = vpack.c.bf16 %v1341_v9, %v1340_v63  ;;  %v1373_v18 = vld [vmem:[%s3357_s5 + $0x1d8] sm:$0xff] }
 0x1b2   :  { %1146 = vmatmul.mubr.f32.vlgmr.msra.gmra.mrb[4].mxu0 %v2868_v17  ;;  %1288 = vmatmul.mubr.f32.vlgmr.msra.gmra.mrb[12].mxu1 %v2868_v17  ;;  %v1314_v17 = vld [vmem:[%s3357_s5] sm:$0xff] }
 0x1b3   :  { %v2058_v23 = vpack.c.bf16 %v1315_v20, %v1314_v17  ;;  %2091 = vmatpush3.bf16.msra.mxu1 %v2090_v26  ;;  %v1325_v17 = vld [vmem:[%s3357_s5 + $0x58] sm:$0xff]  ;;  %v2108_v20 = vpack.c.bf16 %v1373_v18, %v1372_v15  ;;  %v1342_v26 = vld [vmem:[%s3357_s5 + $0xe0] sm:$0xff] }
 0x1b4   :  { %2093 = vmatprep.subr.bf16.mxu1 %v2092_v34  ;;  %v2078_v21 = vpack.c.bf16 %v1325_v17, %v1324_v19  ;;  %v2080_v29 = vpack.c.bf16 %v1343_v27, %v1342_v26  ;;  %v2082_v34 = vpack.c.bf16 %v1327_v32, %v1326_v31  ;;  %v1528_v26 = vld [vmem:[%s3359_s7 + $0x10] sm:$0xff]  ;;  %v1529_v27 = vld [vmem:[%s3359_s7 + $0x18] sm:$0xff]  ;;  %v1530_v31 = vld [vmem:[%s3359_s7 + $0x20] sm:$0xff] }
 0x1b5   :  { %2059 = vmatpush3.bf16.msra.mxu0 %v2058_v23  ;;  %v1356_v23 = vld [vmem:[%s3357_s5 + $0x150] sm:$0xff]  ;;  %v1531_v32 = vld [vmem:[%s3359_s7 + $0x28] sm:$0xff] }
 0x1b6   :  { %2061 = vmatprep.subr.bf16.mxu0 %v2060_v30  ;;  %v2110_v25 = vpack.c.bf16 %v1357_v24, %v1356_v23  ;;  %v1375_v30 = vld [vmem:[%s3357_s5 + $0x1e8] sm:$0xff] }
 0x1b7   :  { %2095 = vmatpush3.bf16.msra.mxu1 %v2094_v40  ;;  %v2112_v33 = vpack.c.bf16 %v1375_v30, %v1374_v28  ;;  %v2124_v30 = vpack.c.bf16 %v1529_v27, %v1528_v26 }
 0x1b8   :  { %2097 = vmatprep.subr.bf16.mxu1 %v2096_v48  ;;  %v1360_v48 = vld [vmem:[%s3357_s5 + $0x170] sm:$0xff] }
 0x1b9   :  { %2063 = vmatpush3.bf16.msra.mxu0 %v2062_v36  ;;  %v1358_v36 = vld [vmem:[%s3357_s5 + $0x160] sm:$0xff]  ;;  %v2118_v51 = vpack.c.bf16 %v1361_v50, %v1360_v48 }
 0x1ba   :  { %2065 = vmatprep.subr.bf16.mxu0 %v2064_v44  ;;  %v2114_v40 = vpack.c.bf16 %v1359_v37, %v1358_v36  ;;  %v2084_v44 = vpack.c.bf16 %v1345_v41, %v1344_v39 }
 0x1bb   :  { %2099 = vmatpush3.bf16.msra.mxu1 %v2098_v52  ;;  %v968_v52 = vsub.s32 0, %v2608_v54 }
 0x1bc   :  { %2101 = vmatprep.subr.bf16.mxu1 %v2100_v60 }
 0x1bd   :  { %2067 = vmatpush3.bf16.msra.mxu0 %v2066_v49  ;;  %v2086_v49 = vpack.c.bf16 %v1329_v47, %v1328_v46  ;;  %v969_v57 = vrot.slane %v964_v55, %v968_v52  ;;  %v1672_v47 = vld [vmem:[%s3360_s8] ss:$0 sm:$0xff] }
 0x1be   :  { %2069 = vmatprep.subr.bf16.mxu0 %v2068_v38  ;;  %v980_v38 = vsub.s32 3, %v2608_v54 }
 0x1bf   :  { %2103 = vmatpush3.bf16.msra.mxu1 %v2102_v0 }
 0x1c0   :  { %2105 = vmatprep.subr.bf16.mxu1 %v2104_v8  ;;  %v981_v60 = vrot.slane %v964_v55, %v980_v38 }
 0x1c1   :  { %2071 = vmatpush3.bf16.msra.mxu0 %v2070_v42 }
 0x1c2   :  { %2073 = vmatprep.subr.bf16.mxu0 %v2072_v3 }
 0x1c3   :  { %2107 = vmatpush3.bf16.msra.mxu1 %v2106_v14 }
 0x1c4   :  { %2109 = vmatprep.subr.bf16.mxu1 %v2108_v20  ;;  %v1526_v20 = vld [vmem:[%s3359_s7] sm:$0xff] }
 0x1c5   :  { %2075 = vmatpush3.bf16.msra.mxu0 %v2074_v10 }
 0x1c6   :  { %2077 = vmatprep.subr.bf16.mxu0 %v2076_v16 }
 0x1c7   :  { %2111 = vmatpush3.bf16.msra.mxu1 %v2110_v25 }
 0x1c8   :  { %2113 = vmatprep.subr.bf16.mxu1 %v2112_v33  ;;  %v2127_v33 = vpack.c.bf16 %v1531_v32, %v1530_v31 }
 0x1c9   :  { %2079 = vmatpush3.bf16.msra.mxu0 %v2078_v21  ;;  %v1527_v21 = vld [vmem:[%s3359_s7 + $0x8] sm:$0xff] }
 0x1ca   :  { %2081 = vmatprep.subr.bf16.mxu0 %v2080_v29  ;;  %v2121_v24 = vpack.c.bf16 %v1527_v21, %v1526_v20 }
 0x1cb   :  { %2115 = vmatpush3.bf16.msra.mxu1 %v2114_v40  ;;  %v1671_v40 = vld [vmem:[%s3358_s6] ss:$0 sm:$0xff]  ;;  %s2205_s6 = smov [#allocation3]  }
 0x1cc   :  { %2117 = vmatprep.subr.bf16.mxu1 %v2116_v45 }
 0x1cd   :  { %2083 = vmatpush3.bf16.msra.mxu0 %v2082_v34  ;;  %v1532_v34 = vld [vmem:[%s3359_s7 + $0x30] sm:$0xff] }
 0x1ce   :  { %2085 = vmatprep.subr.bf16.mxu0 %v2084_v44 }
 0x1cf   :  { %2119 = vmatpush3.bf16.msra.mxu1 %v2118_v51 }
 0x1d1   :  { %2087 = vmatpush3.bf16.msra.mxu0 %v2086_v49 }
 0x1d2   :  { %2120 = vmatprep.subr.bf16.mxu0 %v2198_v22 }
 0x285   :  { %v1147_v42 = vpop.f32.mrb[4].mxu0  ;;  %v1289_v61 = vpop.f32.mrb[12].mxu1 }
 0x286   :  { %v2132_v62 = vadd.f32 %v1147_v42, %v969_v57  ;;  %v2134_v0 = vadd.f32 %v1289_v61, %v977_v58  ;;  %v1149_v1 = vpop.f32.mrb[5].mxu0  ;;  %v1291_v2 = vpop.f32.mrb[13].mxu1 }
 0x287   :  { %v2133_v35 = vadd.f32 %v1149_v1, %v973_v59  ;;  %v2135_v3 = vadd.f32 %v1291_v2, %v981_v60 }
 0x288   :  { %v1294_v4 = vsub.f32 0.0, %v2132_v62  ;;  %v1296_v6 = vsub.f32 0.0, %v2134_v0 }
 0x289   :  { %v1295_v7 = vsub.f32 0.0, %v2133_v35  ;;  %v1297_v8 = vsub.f32 0.0, %v2135_v3 }
 0x28a   :  { %v1298_v10 = vmul.f32 1.442695, %v1294_v4  ;;  %v1302_v12 = vmul.f32 1.442695, %v1296_v6 }
 0x28b   :  { %v1300_v13 = vmul.f32 1.442695, %v1295_v7  ;;  %v1304_v54 = vmul.f32 1.442695, %v1297_v8 }
 0x28c   :  { %2152 = vpow2.f32 %v1298_v10 }
 0x28d   :  { %2154 = vpow2.f32 %v1302_v12 }
 0x28e   :  { %2156 = vpow2.f32 %v1300_v13 }
 0x28f   :  { %2158 = vpow2.f32 %v1304_v54 }
 0x296   :  { %v2153_v14 = vpop.eup %2152 }
 0x297   :  { %v2155_v63 = vpop.eup %2154  ;;  %v1306_v9 = vadd.f32 1.0, %v2153_v14 }
 0x298   :  { %v2157_v15 = vpop.eup %2156  ;;  %v1308_v18 = vadd.f32 1.0, %v2155_v63 }
 0x299   :  { %v2159_v16 = vpop.eup %2158  ;;  %v1307_v19 = vadd.f32 1.0, %v2157_v15  ;;  %2160 = vrcp.f32 %v1306_v9 }
 0x29a   :  { %v1309_v17 = vadd.f32 1.0, %v2159_v16 }
 0x29b   :  { %2162 = vrcp.f32 %v1307_v19 }
 0x29c   :  { %2164 = vrcp.f32 %v1309_v17 }
 0x29d   :  { %2166 = vrcp.f32 %v1308_v18 }
 0x2a3   :  { %v2161_v23 = vpop.eup %2160 }
 0x2a5   :  { %v2163_v25 = vpop.eup %2162 }
 0x2a6   :  { %v2165_v28 = vpop.eup %2164  ;;  %1449 = vmatprep.mubr.f32.mxu0 %v2163_v25 }
 0x2a7   :  { %v2167_v29 = vpop.eup %2166  ;;  %1519 = vmatprep.mubr.f32.mxu1 %v2165_v28  ;;  %1450 = vmatmul.mubr.f32.vlgmr.msra.gmra.mrb[6].mxu0 %v2161_v23 }
 0x2a8   :  { %1520 = vmatmul.mubr.f32.vlgmr.msra.gmra.mrb[14].mxu1 %v2167_v29  ;;  %2122 = vmatpush3.bf16.msra.mxu0 %v2121_v24 }
 0x2a9   :  { %2123 = vmatprep.subr.bf16.mxu0 %v2198_v22  ;;  %1809 = vmatprep.mubr.msk.f32.mxu0 %vm2199_vm1, %v2196_v5  ;;  %v1533_v5 = vld [vmem:[%s3359_s7 + $0x38] sm:$0xff]  ;;  %s1635_s7 = sshll.u32 %s2205_s6, 4  ;;  %s1636_s7 = int_to_ptr.vmem [resolvable:$true] %s1635_s7 }
 0x2aa   :  { %v2130_v36 = vpack.c.bf16 %v1533_v5, %v1532_v34  ;;  %s2172_s8 = scalar_lea.vmem %s1636_s7, 32  ;;  %p2177_p1 = scmp.lt.s32.totalorder %s1636_s7, %s1636_s7 }
 0x2ab   :  { %p2173_p0 = scmp.ne.s32.totalorder %s1636_s7, %s2172_s8  ;;  %p2178_p2 = scmp.lt.s32.totalorder %s2172_s8, %s2172_s8 }
 0x2ac   :  { %2125 = vmatpush3.bf16.msra.mxu0 %v2124_v30 }
 0x2ad   :  { %2126 = vmatprep.subr.bf16.mxu0 %v2198_v22  ;;  %p2179_p3 = por %p2178_p2, %p2177_p1 }
 0x2af   :  { %p2180_p4 = pnand %p2179_p3, %p2173_p0 }
 0x2b0   :  { %2128 = vmatpush3.bf16.msra.mxu0 %v2127_v33 }
 0x2b1   :  { %2129 = vmatprep.subr.bf16.mxu0 %v2198_v22 }
 0x2b4   :  { %2131 = vmatpush3.bf16.msra.mxu0 %v2130_v36 }
 0x37a   :  { %v1718_v37 = vpop.f32.mrb[6].mxu0 }
 0x37b   :  { %v1753_v39 = vpop.f32.mrb[14].mxu1  ;;  %v1719_v41 = vpop.f32.mrb[7].mxu0 }
 0x37c   :  { %v1720_v43 = vadd.f32 %v1719_v41, %v1718_v37  ;;  %v1754_v11 = vpop.f32.mrb[15].mxu1 }
 0x37d   :  { %v1755_v22 = vadd.f32 %v1754_v11, %v1753_v39 }
 0x37e   :  { %v1452_v44 = vadd.f32 %v1720_v43, %v1671_v40 }
 0x380   :  { %v1522_v45 = vadd.f32 %v1755_v22, %v1452_v44 }
 0x382   :  { %v1525_v46 = vmax.f32 %v1522_v45, 0.0 }
 0x384   :  { %1810 = vmatmul.mubr.msk.f32.vlgmr.msra.gmra.mrb[8].mxu0 %vm1541_vm12, %v1525_v46 }
 0x457   :  { %v1611_v48 = vpop.f32.mrb[8].mxu0 }
 0x458   :  { %v1612_v49 = vadd.f32 %v1672_v47, %v1611_v48  ;;  %v1811_v50 = vpop.f32.mrb[9].mxu0 }
 0x45a   :  { %v1616_v51 = vsel %vm1615_vm13, %v1612_v49, -inf }
 0x45b   :  { %1617 = vmax.xlane.f32.xlu1 %v1616_v51 }
 0x4e8   :  { %v1618_v52 = vpop.xlane.xlu1 %1617 }
 0x4e9   :  { %v1619_v53 = vsub.f32 %v1612_v49, %v1618_v52 }
 0x4eb   :  { %v1620_v55 = vmul.f32 1.442695, %v1619_v53 }
 0x4ed   :  { %2168 = vpow2.f32 %v1620_v55 }
 0x4f7   :  { %v2169_v56 = vpop.eup %2168 }
 0x4f8   :  { %v1622_v38 = vsel %vm1615_vm13, %v2169_v56, 0.0 }
 0x4f9   :  { %1623 = vadd.xlane.f32.xlu0 %v1622_v38 }
 0x586   :  { %v1624_v57 = vpop.xlane.xlu0 %1623 }
 0x587   :  { %2170 = vlog2.f32 %v1624_v57 }
 0x591   :  { %v2171_v58 = vpop.eup %2170 }
 0x592   :  { %v1626_v59 = vmul.f32 0.6931472, %v2171_v58 }
 0x594   :  { %v1627_v60 = vsub.f32 %v1619_v53, %v1626_v59 }
 0x596   :  { %1628 = vst.msk [vmem:[#allocation3] sm:$0x3] %vm1615_vm13, %v1627_v60 }
 0x597   :  { %2183 = shalt.err (!%p2180_p4)
}
 0x598   :  { %s2184_s2 = scalar_lea.hbm %s3361_s9, 32 }
 0x599   :  { %p2185_p5 = scmp.ne.s32.totalorder %s3361_s9, %s2184_s2  ;;  %p2188_p6 = scmp.lt.u32.totalorder %s2184_s2, %s3361_s9 }
 0x59b   :  { %p2190_p7 = pnand %p2188_p6, %p2185_p5 }
 0x59d   :  { %2193 = shalt.err (!%p2190_p7)
}
 0x59e   :  { %1638 = dma.vmem_to_hbm [thread:$0]  %s1636_s7, 32, %s3361_s9, [#allocation4]  }
 0x59f   :  { %2194 = dma.done.wait [#allocation4], 32  }
 0x5a0   :  { %2195 = vsyncadd [#allocation4], 4294967264 }
 0x5a1   :  { %1642 = vsyncpa [#allocation4], 1 }

</bundles_post_ra>
